<compile_context>
chip_gen: v7x
topology: tpu7x:2x2x1
jax: 0.10.0
libtpu: 0.0.40
codegen_flags: <defaults>
</compile_context>

<pallas_src>
import functools

import jax
import jax.numpy as jnp
from jax.experimental import pallas as pl
from jax.experimental.pallas import tpu as pltpu


# ------------------------------ fused kernel ---------------------------------

def _dqn_fused_kernel(p_ref, w1_ref, b1_ref, w2_ref, b2_ref, wh_ref, bh_ref,
                      o_ref, *, tb):
    # ---- conv1 (3x3, 3->128) + ReLU + maxpool2, streamed per output-row pair.
    # p_ref block: (4, tb*16, 27); slab ph holds rows b*16 + oh_in_pair*8 + ow.
    pooled = [[None] * 4 for _ in range(4)]
    for ph in range(4):
        xp = p_ref[ph]                                            # (tb*16, 27) bf16
        h = jnp.dot(xp, w1_ref[...], preferred_element_type=jnp.float32)
        h = jnp.maximum(h + b1_ref[...], 0.0)                     # (tb*16, 128) f32
        h = h.reshape(tb, 2, 8, 128)                              # (b, oh_in_pair, ow, c)
        vmax = jnp.maximum(h[:, 0], h[:, 1])                      # (tb, 8, 128)
        for pw in range(4):
            pooled[ph][pw] = jnp.maximum(vmax[:, 2 * pw], vmax[:, 2 * pw + 1])  # (tb,128) f32
    # TODO(synk): Dropout(0.2) after each pool is identity at inference; no RNG mask applied.

    # ---- conv2 (3x3, 128->128) as ONE matmul: (4*tb, 1152) @ (1152, 128).
    # Row r = (oh2*2 + ow2)*tb + b; column block (ki*3+kj) holds the 128 cin of that tap.
    taps = []
    for ki in range(3):
        for kj in range(3):
            tap = jnp.concatenate(
                [pooled[ki][kj], pooled[ki][kj + 1],
                 pooled[ki + 1][kj], pooled[ki + 1][kj + 1]], axis=0)   # (4*tb, 128) f32
            taps.append(tap.astype(jnp.bfloat16))
    x2 = jnp.concatenate(taps, axis=1)                            # (4*tb, 1152) bf16
    h2 = jnp.dot(x2, w2_ref[...], preferred_element_type=jnp.float32)
    h2 = jnp.maximum(h2 + b2_ref[...], 0.0)                       # (4*tb, 128) f32

    # ---- maxpool2 (2x2 -> 1x1): max over the 4 spatial rows of each image == Flatten().
    feat = h2[0:tb]
    for pos in range(1, 4):
        feat = jnp.maximum(feat, h2[pos * tb:(pos + 1) * tb])     # (tb, 128) f32

    # ---- folded head: Linear(128,32) -> Linear(32,9), lane-padded to 128 outputs.
    q = jnp.dot(feat.astype(jnp.bfloat16), wh_ref[...],
                preferred_element_type=jnp.float32) + bh_ref[...]
    o_ref[...] = q.astype(o_ref.dtype)                            # (tb, 128) unmasked lane-dense store


# --------------------------------- wrapper ------------------------------------

def _conv1_patches(x):
    """im2col for the 3-channel input, rows pre-ordered (oh_pair, b, oh_in_pair, ow)
    so the kernel can stream conv1 in output-row pairs and pool immediately."""
    B = x.shape[0]
    cols = [x[:, i:i + 8, j:j + 8, :] for i in range(3) for j in range(3)]
    p = jnp.stack(cols, axis=3)                    # (B, 8, 8, 9, 3): tap = kh*3+kw, then cin
    p = p.reshape(B, 4, 2, 8, 27)                  # (b, oh_pair, oh_in_pair, ow, 27)
    p = p.transpose(1, 0, 2, 3, 4)                 # (oh_pair, b, oh_in_pair, ow, 27)
    return p.reshape(4, B * 16, 27)


def _round_up(n, m):
    return ((n + m - 1) // m) * m


def _pick_batch_tile(bp):
    # Modest tiles keep vreg pressure / compiler spill low; >=2 grid steps lets
    # the "parallel" batch axis shard across v7x's two TensorCores.
    for tb in (16, 32, 8):
        if bp % tb == 0 and bp // tb >= 2:
            return tb
    return 16 if bp % 16 == 0 else 8


@jax.jit
def dqn_forward(params, x):
    # x: (B, 10, 10, 3) float32. PyTorch permutes to NCHW; we stay channels-last.
    B, H, W, C = x.shape
    # Flatten -> Linear(128,32) is only consistent if post-pool2 spatial is 1x1:
    # 10 -conv3-> 8 -pool-> 4 -conv3-> 2 -pool-> 1  (x 128 channels = 128 features).
    assert (H, W, C) == (10, 10, 3), "DQN head requires 10x10x3 inputs (128 flat features)"

    Bp = _round_up(B, 8)                                          # avoid giant single-tile fallback
    if Bp != B:
        x = jnp.pad(x, ((0, Bp - B), (0, 0), (0, 0), (0, 0)))
    tb = _pick_batch_tile(Bp)

    patches = _conv1_patches(x).astype(jnp.bfloat16)              # (4, Bp*16, 27)

    # TODO(synk): real PyTorch weights would need layout conversion
    # (Conv2d (Cout,Cin,KH,KW)->(KH,KW,Cin,Cout); Linear (out,in)->(in,out)).
    w1 = params["w1"].reshape(27, 128).astype(jnp.bfloat16)       # (kh,kw,cin) x cout
    b1 = params["b1"].reshape(1, 128)                             # f32
    w2 = params["w2"].reshape(9 * 128, 128).astype(jnp.bfloat16)  # (kh,kw,cin) on K -> cout
    b2 = params["b2"].reshape(1, 128)                             # f32
    # Fold Linear(128,32) @ Linear(32,9) (no activation in between) into one
    # lane-padded head so the kernel does a single dot and an unmasked store.
    w4p = jnp.pad(params["w4"], ((0, 0), (0, 128 - 9)))           # (32, 128)
    b4p = jnp.pad(params["b4"], (0, 128 - 9))                     # (128,)
    wh = jnp.dot(params["w3"], w4p).astype(jnp.bfloat16)          # (128, 128)
    bh = (jnp.dot(params["b3"], w4p) + b4p).reshape(1, 128)       # f32

    def const(shape):
        return pl.BlockSpec(shape, lambda i: (0,) * len(shape))   # fetched once (constant block)

    out = pl.pallas_call(
        functools.partial(_dqn_fused_kernel, tb=tb),
        out_shape=jax.ShapeDtypeStruct((Bp, 128), jnp.float32),
        grid=(Bp // tb,),
        in_specs=[
            pl.BlockSpec((4, tb * 16, 27), lambda i: (0, i, 0)),  # conv1 patches, batch-tiled
            const((27, 128)), const((1, 128)),                    # w1 (bf16), b1 (f32)
            const((1152, 128)), const((1, 128)),                  # w2 (bf16, taps on K), b2 (f32)
            const((128, 128)), const((1, 128)),                   # folded head (bf16), bias (f32)
        ],
        out_specs=pl.BlockSpec((tb, 128), lambda i: (i, 0)),
        compiler_params=pltpu.CompilerParams(
            dimension_semantics=("parallel",)),                   # batch tiles shard across TCs (v7x)
    )(patches, w1, b1, w2, b2, wh, bh)
    return out[:B, :9]                                            # drop padded rows / zero lanes


def init_params(key):
    ks = jax.random.split(key, 8)
    s = 0.05
    return {
        "w1": jax.random.normal(ks[0], (3, 3, 3, 128), jnp.float32) * s,    # Conv2d(3, 128, 3)
        "b1": jax.random.normal(ks[1], (128,), jnp.float32) * s,
        "w2": jax.random.normal(ks[2], (3, 3, 128, 128), jnp.float32) * s,  # Conv2d(128, 128, 3)
        "b2": jax.random.normal(ks[3], (128,), jnp.float32) * s,
        "w3": jax.random.normal(ks[4], (128, 32), jnp.float32) * s,         # Linear(128, 32)
        "b3": jax.random.normal(ks[5], (32,), jnp.float32) * s,
        "w4": jax.random.normal(ks[6], (32, 9), jnp.float32) * s,           # Linear(32, 9)
        "b4": jax.random.normal(ks[7], (9,), jnp.float32) * s,
    }


if __name__ == "__main__":
    key = jax.random.PRNGKey(0)
    kp, kx = jax.random.split(key)
    params = init_params(kp)
    x = jax.random.normal(kx, (2, 10, 10, 3), jnp.float32)
    q = dqn_forward(params, x)
    jax.block_until_ready(q)
    assert q.shape == (2, 9) and q.dtype == jnp.float32
    print("KERNEL_OK")
</pallas_src>

<mosaic_0001>
module attributes {stable_mosaic.version = 11 : i64} {
  func.func @_dqn_fused_kernel(%arg0: i32, %arg1: memref<4x128x27xbf16, #tpu.memory_space<vmem>>, %arg2: memref<27x128xbf16, #tpu.memory_space<vmem>>, %arg3: memref<1x128xf32, #tpu.memory_space<vmem>>, %arg4: memref<1152x128xbf16, #tpu.memory_space<vmem>>, %arg5: memref<1x128xf32, #tpu.memory_space<vmem>>, %arg6: memref<128x128xbf16, #tpu.memory_space<vmem>>, %arg7: memref<1x128xf32, #tpu.memory_space<vmem>>, %arg8: memref<8x128xf32, #tpu.memory_space<vmem>>) attributes {dimension_semantics = [#tpu.dimension_semantics<parallel>], iteration_bounds = array<i64: 1>, scalar_prefetch = 0 : i64, scratch_operands = 0 : i64, tpu.core_type = #tpu.core_type<tc>, window_params = [{transform_indices = @transform_0, window_bounds = array<i64: 4, 128, 27>}, {pipeline_mode = #tpu.pipeline_mode<synchronous>, transform_indices = @transform_1, window_bounds = array<i64: 27, 128>}, {pipeline_mode = #tpu.pipeline_mode<synchronous>, transform_indices = @transform_2, window_bounds = array<i64: 1, 128>}, {pipeline_mode = #tpu.pipeline_mode<synchronous>, transform_indices = @transform_3, window_bounds = array<i64: 1152, 128>}, {pipeline_mode = #tpu.pipeline_mode<synchronous>, transform_indices = @transform_4, window_bounds = array<i64: 1, 128>}, {pipeline_mode = #tpu.pipeline_mode<synchronous>, transform_indices = @transform_5, window_bounds = array<i64: 128, 128>}, {pipeline_mode = #tpu.pipeline_mode<synchronous>, transform_indices = @transform_6, window_bounds = array<i64: 1, 128>}, {transform_indices = @transform_7, window_bounds = array<i64: 8, 128>}]} {
    %c0 = arith.constant 0 : index
    %c0_0 = arith.constant 0 : index
    %c0_1 = arith.constant 0 : index
    %0 = vector.load %arg1[%c0, %c0_0, %c0_1] : memref<4x128x27xbf16, #tpu.memory_space<vmem>>, vector<1x128x27xbf16>
    %1 = vector.shape_cast %0 : vector<1x128x27xbf16> to vector<128x27xbf16>
    %c0_2 = arith.constant 0 : index
    %c0_3 = arith.constant 0 : index
    %2 = vector.load %arg2[%c0_2, %c0_3] : memref<27x128xbf16, #tpu.memory_space<vmem>>, vector<27x128xbf16>
    %cst = arith.constant dense<0.000000e+00> : vector<128x128xf32>
    %3 = tpu.matmul %1, %2, %cst {dimension_numbers = #tpu.dot_dimension_numbers<[1], [0], [0], [1], [0, 0, 1, 1], [], []>} : vector<128x27xbf16>, vector<27x128xbf16>, vector<128x128xf32> -> vector<128x128xf32>
    %c0_4 = arith.constant 0 : index
    %c0_5 = arith.constant 0 : index
    %4 = vector.load %arg3[%c0_4, %c0_5] : memref<1x128xf32, #tpu.memory_space<vmem>>, vector<1x128xf32>
    %5 = vector.broadcast %4 : vector<1x128xf32> to vector<128x128xf32>
    %6 = arith.addf %3, %5 : vector<128x128xf32>
    %cst_6 = arith.constant 0.000000e+00 : f32
    %7 = vector.broadcast %cst_6 : f32 to vector<128x128xf32>
    %8 = arith.maximumf %6, %7 : vector<128x128xf32>
    %9 = vector.shape_cast %8 : vector<128x128xf32> to vector<8x2x8x128xf32>
    %10 = vector.extract_strided_slice %9 {offsets = [0, 0, 0, 0], sizes = [8, 1, 8, 128], strides = [1, 1, 1, 1]} : vector<8x2x8x128xf32> to vector<8x1x8x128xf32>
    %11 = vector.shape_cast %10 : vector<8x1x8x128xf32> to vector<8x8x128xf32>
    %12 = vector.extract_strided_slice %9 {offsets = [0, 1, 0, 0], sizes = [8, 1, 8, 128], strides = [1, 1, 1, 1]} : vector<8x2x8x128xf32> to vector<8x1x8x128xf32>
    %13 = vector.shape_cast %12 : vector<8x1x8x128xf32> to vector<8x8x128xf32>
    %14 = arith.maximumf %11, %13 : vector<8x8x128xf32>
    %15 = vector.extract_strided_slice %14 {offsets = [0, 0, 0], sizes = [8, 1, 128], strides = [1, 1, 1]} : vector<8x8x128xf32> to vector<8x1x128xf32>
    %16 = vector.shape_cast %15 : vector<8x1x128xf32> to vector<8x128xf32>
    %17 = vector.extract_strided_slice %14 {offsets = [0, 1, 0], sizes = [8, 1, 128], strides = [1, 1, 1]} : vector<8x8x128xf32> to vector<8x1x128xf32>
    %18 = vector.shape_cast %17 : vector<8x1x128xf32> to vector<8x128xf32>
    %19 = arith.maximumf %16, %18 : vector<8x128xf32>
    %20 = vector.extract_strided_slice %14 {offsets = [0, 2, 0], sizes = [8, 1, 128], strides = [1, 1, 1]} : vector<8x8x128xf32> to vector<8x1x128xf32>
    %21 = vector.shape_cast %20 : vector<8x1x128xf32> to vector<8x128xf32>
    %22 = vector.extract_strided_slice %14 {offsets = [0, 3, 0], sizes = [8, 1, 128], strides = [1, 1, 1]} : vector<8x8x128xf32> to vector<8x1x128xf32>
    %23 = vector.shape_cast %22 : vector<8x1x128xf32> to vector<8x128xf32>
    %24 = arith.maximumf %21, %23 : vector<8x128xf32>
    %25 = vector.extract_strided_slice %14 {offsets = [0, 4, 0], sizes = [8, 1, 128], strides = [1, 1, 1]} : vector<8x8x128xf32> to vector<8x1x128xf32>
    %26 = vector.shape_cast %25 : vector<8x1x128xf32> to vector<8x128xf32>
    %27 = vector.extract_strided_slice %14 {offsets = [0, 5, 0], sizes = [8, 1, 128], strides = [1, 1, 1]} : vector<8x8x128xf32> to vector<8x1x128xf32>
    %28 = vector.shape_cast %27 : vector<8x1x128xf32> to vector<8x128xf32>
    %29 = arith.maximumf %26, %28 : vector<8x128xf32>
    %30 = vector.extract_strided_slice %14 {offsets = [0, 6, 0], sizes = [8, 1, 128], strides = [1, 1, 1]} : vector<8x8x128xf32> to vector<8x1x128xf32>
    %31 = vector.shape_cast %30 : vector<8x1x128xf32> to vector<8x128xf32>
    %32 = vector.extract_strided_slice %14 {offsets = [0, 7, 0], sizes = [8, 1, 128], strides = [1, 1, 1]} : vector<8x8x128xf32> to vector<8x1x128xf32>
    %33 = vector.shape_cast %32 : vector<8x1x128xf32> to vector<8x128xf32>
    %34 = arith.maximumf %31, %33 : vector<8x128xf32>
    %c1 = arith.constant 1 : index
    %c0_7 = arith.constant 0 : index
    %c0_8 = arith.constant 0 : index
    %35 = vector.load %arg1[%c1, %c0_7, %c0_8] : memref<4x128x27xbf16, #tpu.memory_space<vmem>>, vector<1x128x27xbf16>
    %36 = vector.shape_cast %35 : vector<1x128x27xbf16> to vector<128x27xbf16>
    %c0_9 = arith.constant 0 : index
    %c0_10 = arith.constant 0 : index
    %37 = vector.load %arg2[%c0_9, %c0_10] : memref<27x128xbf16, #tpu.memory_space<vmem>>, vector<27x128xbf16>
    %cst_11 = arith.constant dense<0.000000e+00> : vector<128x128xf32>
    %38 = tpu.matmul %36, %37, %cst_11 {dimension_numbers = #tpu.dot_dimension_numbers<[1], [0], [0], [1], [0, 0, 1, 1], [], []>} : vector<128x27xbf16>, vector<27x128xbf16>, vector<128x128xf32> -> vector<128x128xf32>
    %c0_12 = arith.constant 0 : index
    %c0_13 = arith.constant 0 : index
    %39 = vector.load %arg3[%c0_12, %c0_13] : memref<1x128xf32, #tpu.memory_space<vmem>>, vector<1x128xf32>
    %40 = vector.broadcast %39 : vector<1x128xf32> to vector<128x128xf32>
    %41 = arith.addf %38, %40 : vector<128x128xf32>
    %cst_14 = arith.constant 0.000000e+00 : f32
    %42 = vector.broadcast %cst_14 : f32 to vector<128x128xf32>
    %43 = arith.maximumf %41, %42 : vector<128x128xf32>
    %44 = vector.shape_cast %43 : vector<128x128xf32> to vector<8x2x8x128xf32>
    %45 = vector.extract_strided_slice %44 {offsets = [0, 0, 0, 0], sizes = [8, 1, 8, 128], strides = [1, 1, 1, 1]} : vector<8x2x8x128xf32> to vector<8x1x8x128xf32>
    %46 = vector.shape_cast %45 : vector<8x1x8x128xf32> to vector<8x8x128xf32>
    %47 = vector.extract_strided_slice %44 {offsets = [0, 1, 0, 0], sizes = [8, 1, 8, 128], strides = [1, 1, 1, 1]} : vector<8x2x8x128xf32> to vector<8x1x8x128xf32>
    %48 = vector.shape_cast %47 : vector<8x1x8x128xf32> to vector<8x8x128xf32>
    %49 = arith.maximumf %46, %48 : vector<8x8x128xf32>
    %50 = vector.extract_strided_slice %49 {offsets = [0, 0, 0], sizes = [8, 1, 128], strides = [1, 1, 1]} : vector<8x8x128xf32> to vector<8x1x128xf32>
    %51 = vector.shape_cast %50 : vector<8x1x128xf32> to vector<8x128xf32>
    %52 = vector.extract_strided_slice %49 {offsets = [0, 1, 0], sizes = [8, 1, 128], strides = [1, 1, 1]} : vector<8x8x128xf32> to vector<8x1x128xf32>
    %53 = vector.shape_cast %52 : vector<8x1x128xf32> to vector<8x128xf32>
    %54 = arith.maximumf %51, %53 : vector<8x128xf32>
    %55 = vector.extract_strided_slice %49 {offsets = [0, 2, 0], sizes = [8, 1, 128], strides = [1, 1, 1]} : vector<8x8x128xf32> to vector<8x1x128xf32>
    %56 = vector.shape_cast %55 : vector<8x1x128xf32> to vector<8x128xf32>
    %57 = vector.extract_strided_slice %49 {offsets = [0, 3, 0], sizes = [8, 1, 128], strides = [1, 1, 1]} : vector<8x8x128xf32> to vector<8x1x128xf32>
    %58 = vector.shape_cast %57 : vector<8x1x128xf32> to vector<8x128xf32>
    %59 = arith.maximumf %56, %58 : vector<8x128xf32>
    %60 = vector.extract_strided_slice %49 {offsets = [0, 4, 0], sizes = [8, 1, 128], strides = [1, 1, 1]} : vector<8x8x128xf32> to vector<8x1x128xf32>
    %61 = vector.shape_cast %60 : vector<8x1x128xf32> to vector<8x128xf32>
    %62 = vector.extract_strided_slice %49 {offsets = [0, 5, 0], sizes = [8, 1, 128], strides = [1, 1, 1]} : vector<8x8x128xf32> to vector<8x1x128xf32>
    %63 = vector.shape_cast %62 : vector<8x1x128xf32> to vector<8x128xf32>
    %64 = arith.maximumf %61, %63 : vector<8x128xf32>
    %65 = vector.extract_strided_slice %49 {offsets = [0, 6, 0], sizes = [8, 1, 128], strides = [1, 1, 1]} : vector<8x8x128xf32> to vector<8x1x128xf32>
    %66 = vector.shape_cast %65 : vector<8x1x128xf32> to vector<8x128xf32>
    %67 = vector.extract_strided_slice %49 {offsets = [0, 7, 0], sizes = [8, 1, 128], strides = [1, 1, 1]} : vector<8x8x128xf32> to vector<8x1x128xf32>
    %68 = vector.shape_cast %67 : vector<8x1x128xf32> to vector<8x128xf32>
    %69 = arith.maximumf %66, %68 : vector<8x128xf32>
    %c2 = arith.constant 2 : index
    %c0_15 = arith.constant 0 : index
    %c0_16 = arith.constant 0 : index
    %70 = vector.load %arg1[%c2, %c0_15, %c0_16] : memref<4x128x27xbf16, #tpu.memory_space<vmem>>, vector<1x128x27xbf16>
    %71 = vector.shape_cast %70 : vector<1x128x27xbf16> to vector<128x27xbf16>
    %c0_17 = arith.constant 0 : index
    %c0_18 = arith.constant 0 : index
    %72 = vector.load %arg2[%c0_17, %c0_18] : memref<27x128xbf16, #tpu.memory_space<vmem>>, vector<27x128xbf16>
    %cst_19 = arith.constant dense<0.000000e+00> : vector<128x128xf32>
    %73 = tpu.matmul %71, %72, %cst_19 {dimension_numbers = #tpu.dot_dimension_numbers<[1], [0], [0], [1], [0, 0, 1, 1], [], []>} : vector<128x27xbf16>, vector<27x128xbf16>, vector<128x128xf32> -> vector<128x128xf32>
    %c0_20 = arith.constant 0 : index
    %c0_21 = arith.constant 0 : index
    %74 = vector.load %arg3[%c0_20, %c0_21] : memref<1x128xf32, #tpu.memory_space<vmem>>, vector<1x128xf32>
    %75 = vector.broadcast %74 : vector<1x128xf32> to vector<128x128xf32>
    %76 = arith.addf %73, %75 : vector<128x128xf32>
    %cst_22 = arith.constant 0.000000e+00 : f32
    %77 = vector.broadcast %cst_22 : f32 to vector<128x128xf32>
    %78 = arith.maximumf %76, %77 : vector<128x128xf32>
    %79 = vector.shape_cast %78 : vector<128x128xf32> to vector<8x2x8x128xf32>
    %80 = vector.extract_strided_slice %79 {offsets = [0, 0, 0, 0], sizes = [8, 1, 8, 128], strides = [1, 1, 1, 1]} : vector<8x2x8x128xf32> to vector<8x1x8x128xf32>
    %81 = vector.shape_cast %80 : vector<8x1x8x128xf32> to vector<8x8x128xf32>
    %82 = vector.extract_strided_slice %79 {offsets = [0, 1, 0, 0], sizes = [8, 1, 8, 128], strides = [1, 1, 1, 1]} : vector<8x2x8x128xf32> to vector<8x1x8x128xf32>
    %83 = vector.shape_cast %82 : vector<8x1x8x128xf32> to vector<8x8x128xf32>
    %84 = arith.maximumf %81, %83 : vector<8x8x128xf32>
    %85 = vector.extract_strided_slice %84 {offsets = [0, 0, 0], sizes = [8, 1, 128], strides = [1, 1, 1]} : vector<8x8x128xf32> to vector<8x1x128xf32>
    %86 = vector.shape_cast %85 : vector<8x1x128xf32> to vector<8x128xf32>
    %87 = vector.extract_strided_slice %84 {offsets = [0, 1, 0], sizes = [8, 1, 128], strides = [1, 1, 1]} : vector<8x8x128xf32> to vector<8x1x128xf32>
    %88 = vector.shape_cast %87 : vector<8x1x128xf32> to vector<8x128xf32>
    %89 = arith.maximumf %86, %88 : vector<8x128xf32>
    %90 = vector.extract_strided_slice %84 {offsets = [0, 2, 0], sizes = [8, 1, 128], strides = [1, 1, 1]} : vector<8x8x128xf32> to vector<8x1x128xf32>
    %91 = vector.shape_cast %90 : vector<8x1x128xf32> to vector<8x128xf32>
    %92 = vector.extract_strided_slice %84 {offsets = [0, 3, 0], sizes = [8, 1, 128], strides = [1, 1, 1]} : vector<8x8x128xf32> to vector<8x1x128xf32>
    %93 = vector.shape_cast %92 : vector<8x1x128xf32> to vector<8x128xf32>
    %94 = arith.maximumf %91, %93 : vector<8x128xf32>
    %95 = vector.extract_strided_slice %84 {offsets = [0, 4, 0], sizes = [8, 1, 128], strides = [1, 1, 1]} : vector<8x8x128xf32> to vector<8x1x128xf32>
    %96 = vector.shape_cast %95 : vector<8x1x128xf32> to vector<8x128xf32>
    %97 = vector.extract_strided_slice %84 {offsets = [0, 5, 0], sizes = [8, 1, 128], strides = [1, 1, 1]} : vector<8x8x128xf32> to vector<8x1x128xf32>
    %98 = vector.shape_cast %97 : vector<8x1x128xf32> to vector<8x128xf32>
    %99 = arith.maximumf %96, %98 : vector<8x128xf32>
    %100 = vector.extract_strided_slice %84 {offsets = [0, 6, 0], sizes = [8, 1, 128], strides = [1, 1, 1]} : vector<8x8x128xf32> to vector<8x1x128xf32>
    %101 = vector.shape_cast %100 : vector<8x1x128xf32> to vector<8x128xf32>
    %102 = vector.extract_strided_slice %84 {offsets = [0, 7, 0], sizes = [8, 1, 128], strides = [1, 1, 1]} : vector<8x8x128xf32> to vector<8x1x128xf32>
    %103 = vector.shape_cast %102 : vector<8x1x128xf32> to vector<8x128xf32>
    %104 = arith.maximumf %101, %103 : vector<8x128xf32>
    %c3 = arith.constant 3 : index
    %c0_23 = arith.constant 0 : index
    %c0_24 = arith.constant 0 : index
    %105 = vector.load %arg1[%c3, %c0_23, %c0_24] : memref<4x128x27xbf16, #tpu.memory_space<vmem>>, vector<1x128x27xbf16>
    %106 = vector.shape_cast %105 : vector<1x128x27xbf16> to vector<128x27xbf16>
    %c0_25 = arith.constant 0 : index
    %c0_26 = arith.constant 0 : index
    %107 = vector.load %arg2[%c0_25, %c0_26] : memref<27x128xbf16, #tpu.memory_space<vmem>>, vector<27x128xbf16>
    %cst_27 = arith.constant dense<0.000000e+00> : vector<128x128xf32>
    %108 = tpu.matmul %106, %107, %cst_27 {dimension_numbers = #tpu.dot_dimension_numbers<[1], [0], [0], [1], [0, 0, 1, 1], [], []>} : vector<128x27xbf16>, vector<27x128xbf16>, vector<128x128xf32> -> vector<128x128xf32>
    %c0_28 = arith.constant 0 : index
    %c0_29 = arith.constant 0 : index
    %109 = vector.load %arg3[%c0_28, %c0_29] : memref<1x128xf32, #tpu.memory_space<vmem>>, vector<1x128xf32>
    %110 = vector.broadcast %109 : vector<1x128xf32> to vector<128x128xf32>
    %111 = arith.addf %108, %110 : vector<128x128xf32>
    %cst_30 = arith.constant 0.000000e+00 : f32
    %112 = vector.broadcast %cst_30 : f32 to vector<128x128xf32>
    %113 = arith.maximumf %111, %112 : vector<128x128xf32>
    %114 = vector.shape_cast %113 : vector<128x128xf32> to vector<8x2x8x128xf32>
    %115 = vector.extract_strided_slice %114 {offsets = [0, 0, 0, 0], sizes = [8, 1, 8, 128], strides = [1, 1, 1, 1]} : vector<8x2x8x128xf32> to vector<8x1x8x128xf32>
    %116 = vector.shape_cast %115 : vector<8x1x8x128xf32> to vector<8x8x128xf32>
    %117 = vector.extract_strided_slice %114 {offsets = [0, 1, 0, 0], sizes = [8, 1, 8, 128], strides = [1, 1, 1, 1]} : vector<8x2x8x128xf32> to vector<8x1x8x128xf32>
    %118 = vector.shape_cast %117 : vector<8x1x8x128xf32> to vector<8x8x128xf32>
    %119 = arith.maximumf %116, %118 : vector<8x8x128xf32>
    %120 = vector.extract_strided_slice %119 {offsets = [0, 0, 0], sizes = [8, 1, 128], strides = [1, 1, 1]} : vector<8x8x128xf32> to vector<8x1x128xf32>
    %121 = vector.shape_cast %120 : vector<8x1x128xf32> to vector<8x128xf32>
    %122 = vector.extract_strided_slice %119 {offsets = [0, 1, 0], sizes = [8, 1, 128], strides = [1, 1, 1]} : vector<8x8x128xf32> to vector<8x1x128xf32>
    %123 = vector.shape_cast %122 : vector<8x1x128xf32> to vector<8x128xf32>
    %124 = arith.maximumf %121, %123 : vector<8x128xf32>
    %125 = vector.extract_strided_slice %119 {offsets = [0, 2, 0], sizes = [8, 1, 128], strides = [1, 1, 1]} : vector<8x8x128xf32> to vector<8x1x128xf32>
    %126 = vector.shape_cast %125 : vector<8x1x128xf32> to vector<8x128xf32>
    %127 = vector.extract_strided_slice %119 {offsets = [0, 3, 0], sizes = [8, 1, 128], strides = [1, 1, 1]} : vector<8x8x128xf32> to vector<8x1x128xf32>
    %128 = vector.shape_cast %127 : vector<8x1x128xf32> to vector<8x128xf32>
    %129 = arith.maximumf %126, %128 : vector<8x128xf32>
    %130 = vector.extract_strided_slice %119 {offsets = [0, 4, 0], sizes = [8, 1, 128], strides = [1, 1, 1]} : vector<8x8x128xf32> to vector<8x1x128xf32>
    %131 = vector.shape_cast %130 : vector<8x1x128xf32> to vector<8x128xf32>
    %132 = vector.extract_strided_slice %119 {offsets = [0, 5, 0], sizes = [8, 1, 128], strides = [1, 1, 1]} : vector<8x8x128xf32> to vector<8x1x128xf32>
    %133 = vector.shape_cast %132 : vector<8x1x128xf32> to vector<8x128xf32>
    %134 = arith.maximumf %131, %133 : vector<8x128xf32>
    %135 = vector.extract_strided_slice %119 {offsets = [0, 6, 0], sizes = [8, 1, 128], strides = [1, 1, 1]} : vector<8x8x128xf32> to vector<8x1x128xf32>
    %136 = vector.shape_cast %135 : vector<8x1x128xf32> to vector<8x128xf32>
    %137 = vector.extract_strided_slice %119 {offsets = [0, 7, 0], sizes = [8, 1, 128], strides = [1, 1, 1]} : vector<8x8x128xf32> to vector<8x1x128xf32>
    %138 = vector.shape_cast %137 : vector<8x1x128xf32> to vector<8x128xf32>
    %139 = arith.maximumf %136, %138 : vector<8x128xf32>
    %140 = tpu.concatenate %19, %24, %54, %59 in 0 : vector<8x128xf32>, vector<8x128xf32>, vector<8x128xf32>, vector<8x128xf32> -> vector<32x128xf32>
    %141 = arith.truncf %140 : vector<32x128xf32> to vector<32x128xbf16>
    %142 = tpu.concatenate %24, %29, %59, %64 in 0 : vector<8x128xf32>, vector<8x128xf32>, vector<8x128xf32>, vector<8x128xf32> -> vector<32x128xf32>
    %143 = arith.truncf %142 : vector<32x128xf32> to vector<32x128xbf16>
    %144 = tpu.concatenate %29, %34, %64, %69 in 0 : vector<8x128xf32>, vector<8x128xf32>, vector<8x128xf32>, vector<8x128xf32> -> vector<32x128xf32>
    %145 = arith.truncf %144 : vector<32x128xf32> to vector<32x128xbf16>
    %146 = tpu.concatenate %54, %59, %89, %94 in 0 : vector<8x128xf32>, vector<8x128xf32>, vector<8x128xf32>, vector<8x128xf32> -> vector<32x128xf32>
    %147 = arith.truncf %146 : vector<32x128xf32> to vector<32x128xbf16>
    %148 = tpu.concatenate %59, %64, %94, %99 in 0 : vector<8x128xf32>, vector<8x128xf32>, vector<8x128xf32>, vector<8x128xf32> -> vector<32x128xf32>
    %149 = arith.truncf %148 : vector<32x128xf32> to vector<32x128xbf16>
    %150 = tpu.concatenate %64, %69, %99, %104 in 0 : vector<8x128xf32>, vector<8x128xf32>, vector<8x128xf32>, vector<8x128xf32> -> vector<32x128xf32>
    %151 = arith.truncf %150 : vector<32x128xf32> to vector<32x128xbf16>
    %152 = tpu.concatenate %89, %94, %124, %129 in 0 : vector<8x128xf32>, vector<8x128xf32>, vector<8x128xf32>, vector<8x128xf32> -> vector<32x128xf32>
    %153 = arith.truncf %152 : vector<32x128xf32> to vector<32x128xbf16>
    %154 = tpu.concatenate %94, %99, %129, %134 in 0 : vector<8x128xf32>, vector<8x128xf32>, vector<8x128xf32>, vector<8x128xf32> -> vector<32x128xf32>
    %155 = arith.truncf %154 : vector<32x128xf32> to vector<32x128xbf16>
    %156 = tpu.concatenate %99, %104, %134, %139 in 0 : vector<8x128xf32>, vector<8x128xf32>, vector<8x128xf32>, vector<8x128xf32> -> vector<32x128xf32>
    %157 = arith.truncf %156 : vector<32x128xf32> to vector<32x128xbf16>
    %158 = tpu.concatenate %141, %143, %145, %147, %149, %151, %153, %155, %157 in 1 : vector<32x128xbf16>, vector<32x128xbf16>, vector<32x128xbf16>, vector<32x128xbf16>, vector<32x128xbf16>, vector<32x128xbf16>, vector<32x128xbf16>, vector<32x128xbf16>, vector<32x128xbf16> -> vector<32x1152xbf16>
    %c0_31 = arith.constant 0 : index
    %c0_32 = arith.constant 0 : index
    %159 = vector.load %arg4[%c0_31, %c0_32] : memref<1152x128xbf16, #tpu.memory_space<vmem>>, vector<1152x128xbf16>
    %cst_33 = arith.constant dense<0.000000e+00> : vector<32x128xf32>
    %160 = tpu.matmul %158, %159, %cst_33 {dimension_numbers = #tpu.dot_dimension_numbers<[1], [0], [0], [1], [0, 0, 1, 1], [], []>} : vector<32x1152xbf16>, vector<1152x128xbf16>, vector<32x128xf32> -> vector<32x128xf32>
    %c0_34 = arith.constant 0 : index
    %c0_35 = arith.constant 0 : index
    %161 = vector.load %arg5[%c0_34, %c0_35] : memref<1x128xf32, #tpu.memory_space<vmem>>, vector<1x128xf32>
    %162 = vector.broadcast %161 : vector<1x128xf32> to vector<32x128xf32>
    %163 = arith.addf %160, %162 : vector<32x128xf32>
    %cst_36 = arith.constant 0.000000e+00 : f32
    %164 = vector.broadcast %cst_36 : f32 to vector<32x128xf32>
    %165 = arith.maximumf %163, %164 : vector<32x128xf32>
    %166 = vector.extract_strided_slice %165 {offsets = [0, 0], sizes = [8, 128], strides = [1, 1]} : vector<32x128xf32> to vector<8x128xf32>
    %167 = vector.extract_strided_slice %165 {offsets = [8, 0], sizes = [8, 128], strides = [1, 1]} : vector<32x128xf32> to vector<8x128xf32>
    %168 = arith.maximumf %166, %167 : vector<8x128xf32>
    %169 = vector.extract_strided_slice %165 {offsets = [16, 0], sizes = [8, 128], strides = [1, 1]} : vector<32x128xf32> to vector<8x128xf32>
    %170 = arith.maximumf %168, %169 : vector<8x128xf32>
    %171 = vector.extract_strided_slice %165 {offsets = [24, 0], sizes = [8, 128], strides = [1, 1]} : vector<32x128xf32> to vector<8x128xf32>
    %172 = arith.maximumf %170, %171 : vector<8x128xf32>
    %173 = arith.truncf %172 : vector<8x128xf32> to vector<8x128xbf16>
    %c0_37 = arith.constant 0 : index
    %c0_38 = arith.constant 0 : index
    %174 = vector.load %arg6[%c0_37, %c0_38] : memref<128x128xbf16, #tpu.memory_space<vmem>>, vector<128x128xbf16>
    %cst_39 = arith.constant dense<0.000000e+00> : vector<8x128xf32>
    %175 = tpu.matmul %173, %174, %cst_39 {dimension_numbers = #tpu.dot_dimension_numbers<[1], [0], [0], [1], [0, 0, 1, 1], [], []>} : vector<8x128xbf16>, vector<128x128xbf16>, vector<8x128xf32> -> vector<8x128xf32>
    %c0_40 = arith.constant 0 : index
    %c0_41 = arith.constant 0 : index
    %176 = vector.load %arg7[%c0_40, %c0_41] : memref<1x128xf32, #tpu.memory_space<vmem>>, vector<1x128xf32>
    %177 = vector.broadcast %176 : vector<1x128xf32> to vector<8x128xf32>
    %178 = arith.addf %175, %177 : vector<8x128xf32>
    %c0_42 = arith.constant 0 : index
    %c0_43 = arith.constant 0 : index
    %179 = vector.load %arg8[%c0_42, %c0_43] : memref<8x128xf32, #tpu.memory_space<vmem>>, vector<8x128xf32>
    tpu.vector_store %arg8[%c0_42, %c0_43], %178 {strides = array<i32>} : memref<8x128xf32, #tpu.memory_space<vmem>>, vector<8x128xf32>,
    return
  }
  func.func @transform_0(%arg0: i32) -> (i32, i32, i32) {
    %c0_i32 = arith.constant 0 : i32
    %c0_i32_0 = arith.constant 0 : i32
    %c0_i32_1 = arith.constant 0 : i32
    return %c0_i32, %arg0, %c0_i32_0 : i32, i32, i32
  }
  func.func @transform_1(%arg0: i32) -> (i32, i32) {
    %c0_i32 = arith.constant 0 : i32
    %c0_i32_0 = arith.constant 0 : i32
    %c0_i32_1 = arith.constant 0 : i32
    return %c0_i32, %c0_i32_0 : i32, i32
  }
  func.func @transform_2(%arg0: i32) -> (i32, i32) {
    %c0_i32 = arith.constant 0 : i32
    %c0_i32_0 = arith.constant 0 : i32
    %c0_i32_1 = arith.constant 0 : i32
    return %c0_i32, %c0_i32_0 : i32, i32
  }
  func.func @transform_3(%arg0: i32) -> (i32, i32) {
    %c0_i32 = arith.constant 0 : i32
    %c0_i32_0 = arith.constant 0 : i32
    %c0_i32_1 = arith.constant 0 : i32
    return %c0_i32, %c0_i32_0 : i32, i32
  }
  func.func @transform_4(%arg0: i32) -> (i32, i32) {
    %c0_i32 = arith.constant 0 : i32
    %c0_i32_0 = arith.constant 0 : i32
    %c0_i32_1 = arith.constant 0 : i32
    return %c0_i32, %c0_i32_0 : i32, i32
  }
  func.func @transform_5(%arg0: i32) -> (i32, i32) {
    %c0_i32 = arith.constant 0 : i32
    %c0_i32_0 = arith.constant 0 : i32
    %c0_i32_1 = arith.constant 0 : i32
    return %c0_i32, %c0_i32_0 : i32, i32
  }
  func.func @transform_6(%arg0: i32) -> (i32, i32) {
    %c0_i32 = arith.constant 0 : i32
    %c0_i32_0 = arith.constant 0 : i32
    %c0_i32_1 = arith.constant 0 : i32
    return %c0_i32, %c0_i32_0 : i32, i32
  }
  func.func @transform_7(%arg0: i32) -> (i32, i32) {
    %c0_i32 = arith.constant 0 : i32
    %c0_i32_0 = arith.constant 0 : i32
    return %arg0, %c0_i32 : i32, i32
  }
}

</mosaic_0001>

<bundles_post_ra>
// kernel: dqn_forward.1
= control target key start
LH: loop header
LB: loop body
LE: loop exit
PB: predicated region body
PF: predicated region fallthrough
CT: control target
= control target key end

     0   :  { %vm130_vm0 = vcmask 1044480   ;;  %vm131_vm1 = vcmask 1045504   ;;  %vm105_vm2 = vcmask 220160   ;;  %v2840_v1 = vmov 65535   ;;  %s3872_s1 = inlined_call_operand.vmem [shape: bf16[27,128], index: 1, kind: input, shape index: {}]   ;;  %s3873_s0 = inlined_call_operand.vmem [shape: bf16[4,128,27], index: 0, kind: input, shape index: {}]   ;;  %s3874_s3 = inlined_call_operand.vmem [shape: bf16[1152,128], index: 3, kind: input, shape index: {}]   ;;  %s3875_s2 = inlined_call_operand.vmem [shape: f32[1,128], index: 2, kind: input, shape index: {}]   ;;  %s3876_s5 = inlined_call_operand.vmem [shape: bf16[128,128], index: 5, kind: input, shape index: {}]   ;;  %s3877_s4 = inlined_call_operand.vmem [shape: f32[1,128], index: 4, kind: input, shape index: {}]   ;;  %s3878_s6 = inlined_call_operand.vmem [shape: f32[1,128], index: 6, kind: input, shape index: {}]   ;;  %s3879_s7 = inlined_call_operand.vmem [shape: f32[8,128], index: 7, kind: output, shape index: {}]  }
   0x1   :  { %v2726_v0 = vld [vmem:[%s3872_s1] sm:$0xff]   ;;  %v132_v2 = vsel %vm130_vm0, 4294967295, %v2840_v1  ;;  %v2727_v3 = vld [vmem:[%s3872_s1 + $0x8] sm:$0x3f]   ;;  %v2732_v10 = vld [vmem:[%s3873_s0 + $0x10] sm:$0xff]   ;;  %vm1001_vm3 = vcmask 1041409  }
   0x2   :  { %2603 = vmatprep.subr.bf16.mxu0 %v2726_v0  ;;  %2623 = vmatprep.subr.bf16.mxu1 %v2726_v0  ;;  %v133_v4 = vsel %vm131_vm1, %v132_v2, 0  ;;  %v2728_v5 = vld [vmem:[%s3873_s0] sm:$0xff]   ;;  %v2730_v8 = vld [vmem:[%s3873_s0 + $0x8] sm:$0xff]   ;;  %v2733_v11 = vld [vmem:[%s3873_s0 + $0x50] sm:$0xff]   ;;  %vm1004_vm4 = vcmask 1042434   ;;  %vm1007_vm5 = vcmask 1043459  }
   0x3   :  { %2604 = vmatpush3.bf16.msra.mxu0 %v2726_v0  ;;  %2624 = vmatpush3.bf16.msra.mxu1 %v2726_v0  ;;  %v135_v6 = vand.u32 %v2727_v3, %v133_v4  ;;  %v2729_v7 = vld [vmem:[%s3873_s0 + $0x40] sm:$0xff]   ;;  %v2731_v9 = vld [vmem:[%s3873_s0 + $0x48] sm:$0xff]   ;;  %v2734_v12 = vld [vmem:[%s3873_s0 + $0x18] sm:$0xff]   ;;  %vm1010_vm6 = vcmask 1044484   ;;  %vm1013_vm7 = vcmask 1045509   ;;  %vm1016_vm8 = vcmask 1046534  }
   0x4   :  { %2607 = vmatprep.mubr.msk.bf16.mxu0 %vm105_vm2, %v2728_v5  ;;  %2627 = vmatprep.mubr.msk.bf16.mxu1 %vm105_vm2, %v2729_v7  ;;  %v2735_v13 = vld [vmem:[%s3873_s0 + $0x58] sm:$0xff]   ;;  %v2736_v14 = vld [vmem:[%s3873_s0 + $0x20] sm:$0xff]   ;;  %v2738_v16 = vld [vmem:[%s3873_s0 + $0x28] sm:$0xff]   ;;  %vm1019_vm9 = vcmask 1047559   ;;  %vm2842_vm10 = vmmov 0  }
   0x5   :  { %2605 = vmatprep.subr.bf16.mxu0 %v135_v6  ;;  %2625 = vmatprep.subr.bf16.mxu1 %v135_v6  ;;  %v2737_v15 = vld [vmem:[%s3873_s0 + $0x60] sm:$0xff]   ;;  %v2739_v17 = vld [vmem:[%s3873_s0 + $0x68] sm:$0xff]   ;;  %v2740_v18 = vld [vmem:[%s3873_s0 + $0x30] sm:$0xff]  }
   0x6   :  { %v2741_v19 = vld [vmem:[%s3873_s0 + $0x70] sm:$0xff]   ;;  %v2742_v20 = vld [vmem:[%s3873_s0 + $0x38] sm:$0xff]   ;;  %v2744_v22 = vld [vmem:[%s3873_s0 + $0x80] sm:$0xff]  }
   0x7   :  { %2606 = vmatpush3.bf16.msra.mxu0 %v135_v6  ;;  %2626 = vmatpush3.bf16.msra.mxu1 %v135_v6  ;;  %v2743_v21 = vld [vmem:[%s3873_s0 + $0x78] sm:$0xff]   ;;  %v2746_v23 = vld [vmem:[%s3873_s0 + $0xc0] sm:$0xff]   ;;  %v2745_v24 = vld [vmem:[%s3873_s0 + $0x88] sm:$0xff]  }
   0x8   :  { %2643 = vmatprep.subr.bf16.mxu0 %v2726_v0  ;;  %2663 = vmatprep.subr.bf16.mxu1 %v2726_v0  ;;  %v2747_v25 = vld [vmem:[%s3873_s0 + $0xc8] sm:$0xff]   ;;  %v2748_v26 = vld [vmem:[%s3873_s0 + $0x90] sm:$0xff]   ;;  %v2749_v28 = vld [vmem:[%s3873_s0 + $0x98] sm:$0xff]  }
   0x9   :  { %v2750_v27 = vld [vmem:[%s3873_s0 + $0xd0] sm:$0xff]   ;;  %v2751_v29 = vld [vmem:[%s3873_s0 + $0xd8] sm:$0xff]   ;;  %v2752_v30 = vld [vmem:[%s3873_s0 + $0xa0] sm:$0xff]  }
   0xa   :  { %2608 = vmatmul.mubr.msk.bf16.vlgmr.msra.gmra.mrb[0].mxu0 %vm105_vm2, %v2730_v8  ;;  %2628 = vmatmul.mubr.msk.bf16.vlgmr.msra.gmra.mrb[0].mxu1 %vm105_vm2, %v2731_v9  ;;  %v2754_v31 = vld [vmem:[%s3873_s0 + $0xe0] sm:$0xff]   ;;  %v2753_v32 = vld [vmem:[%s3873_s0 + $0xa8] sm:$0xff]   ;;  %v2756_v34 = vld [vmem:[%s3873_s0 + $0xb0] sm:$0xff]  }
   0xb   :  { %2611 = vmatprep.mubr.msk.bf16.mxu0 %vm105_vm2, %v2732_v10  ;;  %2631 = vmatprep.mubr.msk.bf16.mxu1 %vm105_vm2, %v2733_v11  ;;  %v2755_v33 = vld [vmem:[%s3873_s0 + $0xe8] sm:$0xff]   ;;  %v2758_v35 = vld [vmem:[%s3873_s0 + $0xf0] sm:$0xff]   ;;  %v2757_v36 = vld [vmem:[%s3873_s0 + $0xb8] sm:$0xff]  }
   0xc   :  { %2644 = vmatpush3.bf16.msra.mxu0 %v2726_v0  ;;  %2664 = vmatpush3.bf16.msra.mxu1 %v2726_v0  ;;  %v2759_v37 = vld [vmem:[%s3873_s0 + $0xf8] sm:$0xff]   ;;  %v2760_v38 = vld [vmem:[%s3874_s3 + $0x40] sm:$0xff]   ;;  %v2764_v42 = vld [vmem:[%s3874_s3 + $0x48] sm:$0xff]  }
   0xd   :  { %2645 = vmatprep.subr.bf16.mxu0 %v135_v6  ;;  %2665 = vmatprep.subr.bf16.mxu1 %v135_v6  ;;  %v2761_v39 = vld [vmem:[%s3874_s3] sm:$0xff]   ;;  %v2765_v43 = vld [vmem:[%s3874_s3 + $0x8] sm:$0xff]   ;;  %v2768_v46 = vld [vmem:[%s3874_s3 + $0x50] sm:$0xff]  }
   0xe   :  { %v2762_v40 = vld [vmem:[%s3874_s3 + $0xc0] sm:$0xff]   ;;  %v2766_v44 = vld [vmem:[%s3874_s3 + $0xc8] sm:$0xff]   ;;  %v2769_v47 = vld [vmem:[%s3874_s3 + $0x10] sm:$0xff]  }
   0xf   :  { %v2763_v41 = vld [vmem:[%s3874_s3 + $0x80] sm:$0xff]   ;;  %v2767_v45 = vld [vmem:[%s3874_s3 + $0x88] sm:$0xff]   ;;  %v2770_v48 = vld [vmem:[%s3874_s3 + $0xd0] sm:$0xff]  }
  0x10   :  { %2646 = vmatpush3.bf16.msra.mxu0 %v135_v6  ;;  %2666 = vmatpush3.bf16.msra.mxu1 %v135_v6  ;;  %v2771_v49 = vld [vmem:[%s3874_s3 + $0x90] sm:$0xff]   ;;  %v2772_v50 = vld [vmem:[%s3874_s3 + $0x58] sm:$0xff]   ;;  %v2776_v54 = vld [vmem:[%s3874_s3 + $0x60] sm:$0xff]  }
  0x11   :  { %2472 = vmatprep.subr.bf16.mxu0 %v2760_v38  ;;  %2500 = vmatprep.subr.bf16.mxu1 %v2762_v40  ;;  %v2773_v51 = vld [vmem:[%s3874_s3 + $0x18] sm:$0xff]   ;;  %v2777_v55 = vld [vmem:[%s3874_s3 + $0x20] sm:$0xff]   ;;  %v2780_v58 = vld [vmem:[%s3874_s3 + $0x68] sm:$0xff]  }
  0x12   :  { %2612 = vmatmul.mubr.msk.bf16.gmra.mrb[4].mxu0 %vm105_vm2, %v2734_v12  ;;  %2632 = vmatmul.mubr.msk.bf16.gmra.mrb[4].mxu1 %vm105_vm2, %v2735_v13  ;;  %v2774_v52 = vld [vmem:[%s3874_s3 + $0xd8] sm:$0xff]   ;;  %v2778_v56 = vld [vmem:[%s3874_s3 + $0xe0] sm:$0xff]   ;;  %v2781_v59 = vld [vmem:[%s3874_s3 + $0x28] sm:$0xff]  }
  0x13   :  { %2615 = vmatprep.mubr.msk.bf16.mxu0 %vm105_vm2, %v2736_v14  ;;  %2635 = vmatprep.mubr.msk.bf16.mxu1 %vm105_vm2, %v2737_v15  ;;  %v2775_v53 = vld [vmem:[%s3874_s3 + $0x98] sm:$0xff]   ;;  %v2779_v57 = vld [vmem:[%s3874_s3 + $0xa0] sm:$0xff]   ;;  %v2782_v60 = vld [vmem:[%s3874_s3 + $0xe8] sm:$0xff]  }
  0x14   :  { %v2783_v61 = vld [vmem:[%s3874_s3 + $0xa8] sm:$0xff]   ;;  %v2784_v62 = vld [vmem:[%s3874_s3 + $0x70] sm:$0xff]   ;;  %v2788_v2 = vld [vmem:[%s3874_s3 + $0x78] sm:$0xff]  }
  0x15   :  { %v2785_v63 = vld [vmem:[%s3874_s3 + $0x30] sm:$0xff]   ;;  %v2789_v3 = vld [vmem:[%s3874_s3 + $0x38] sm:$0xff]   ;;  %v2792_v6 = vld [vmem:[%s3874_s3 + $0x140] sm:$0xff]  }
  0x16   :  { %v2786_v0 = vld [vmem:[%s3874_s3 + $0xf0] sm:$0xff]   ;;  %v2790_v4 = vld [vmem:[%s3874_s3 + $0xf8] sm:$0xff]   ;;  %v2798_v7 = vld [vmem:[%s3874_s3 + $0x1c0] sm:$0xff]  }
  0x17   :  { %v2787_v1 = vld [vmem:[%s3874_s3 + $0xb0] sm:$0xff]   ;;  %v2791_v5 = vld [vmem:[%s3874_s3 + $0xb8] sm:$0xff]   ;;  %v3122_v8 = vld [vmem:[%s3875_s2] ss:$0 sm:$0xff] }
  0x1a   :  { %2616 = vmatmul.mubr.msk.bf16.gmra.mrb[8].mxu0 %vm105_vm2, %v2738_v16  ;;  %2636 = vmatmul.mubr.msk.bf16.gmra.mrb[8].mxu1 %vm105_vm2, %v2739_v17 }
  0x1b   :  { %2619 = vmatprep.mubr.msk.bf16.mxu0 %vm105_vm2, %v2740_v18  ;;  %2639 = vmatprep.mubr.msk.bf16.mxu1 %vm105_vm2, %v2741_v19 }
  0x22   :  { %2620 = vmatmul.mubr.msk.bf16.gmra.mrb[12].mxu0 %vm105_vm2, %v2742_v20  ;;  %2640 = vmatmul.mubr.msk.bf16.gmra.mrb[12].mxu1 %vm105_vm2, %v2743_v21 }
  0x23   :  { %2647 = vmatprep.mubr.msk.bf16.mxu0 %vm105_vm2, %v2744_v22  ;;  %2667 = vmatprep.mubr.msk.bf16.mxu1 %vm105_vm2, %v2746_v23 }
  0x2a   :  { %2648 = vmatmul.mubr.msk.bf16.vlgmr.msra.gmra.mrb[16].mxu0 %vm105_vm2, %v2745_v24  ;;  %2668 = vmatmul.mubr.msk.bf16.vlgmr.msra.gmra.mrb[16].mxu1 %vm105_vm2, %v2747_v25 }
  0x2b   :  { %2651 = vmatprep.mubr.msk.bf16.mxu0 %vm105_vm2, %v2748_v26  ;;  %2671 = vmatprep.mubr.msk.bf16.mxu1 %vm105_vm2, %v2750_v27 }
  0x2c   :  { %2473 = vmatpush3.bf16.msra.mxu0 %v2761_v39  ;;  %2501 = vmatpush3.bf16.msra.mxu1 %v2763_v41 }
  0x2d   :  { %2474 = vmatprep.subr.bf16.mxu0 %v2764_v42  ;;  %2502 = vmatprep.subr.bf16.mxu1 %v2766_v44 }
  0x30   :  { %2475 = vmatpush3.bf16.msra.mxu0 %v2765_v43  ;;  %2503 = vmatpush3.bf16.msra.mxu1 %v2767_v45 }
  0x31   :  { %2476 = vmatprep.subr.bf16.mxu0 %v2768_v46  ;;  %2504 = vmatprep.subr.bf16.mxu1 %v2770_v48 }
  0x32   :  { %2652 = vmatmul.mubr.msk.bf16.gmra.mrb[20].mxu0 %vm105_vm2, %v2749_v28  ;;  %2672 = vmatmul.mubr.msk.bf16.gmra.mrb[20].mxu1 %vm105_vm2, %v2751_v29 }
  0x33   :  { %2655 = vmatprep.mubr.msk.bf16.mxu0 %vm105_vm2, %v2752_v30  ;;  %2675 = vmatprep.mubr.msk.bf16.mxu1 %vm105_vm2, %v2754_v31 }
  0x34   :  { %2477 = vmatpush3.bf16.msra.mxu0 %v2769_v47  ;;  %2505 = vmatpush3.bf16.msra.mxu1 %v2771_v49 }
  0x35   :  { %2478 = vmatprep.subr.bf16.mxu0 %v2772_v50  ;;  %2506 = vmatprep.subr.bf16.mxu1 %v2774_v52 }
  0x38   :  { %2479 = vmatpush3.bf16.msra.mxu0 %v2773_v51  ;;  %2507 = vmatpush3.bf16.msra.mxu1 %v2775_v53 }
  0x39   :  { %2480 = vmatprep.subr.bf16.mxu0 %v2776_v54  ;;  %2508 = vmatprep.subr.bf16.mxu1 %v2778_v56 }
  0x3a   :  { %2656 = vmatmul.mubr.msk.bf16.gmra.mrb[24].mxu0 %vm105_vm2, %v2753_v32  ;;  %2676 = vmatmul.mubr.msk.bf16.gmra.mrb[24].mxu1 %vm105_vm2, %v2755_v33 }
  0x3b   :  { %2659 = vmatprep.mubr.msk.bf16.mxu0 %vm105_vm2, %v2756_v34  ;;  %2679 = vmatprep.mubr.msk.bf16.mxu1 %vm105_vm2, %v2758_v35 }
  0x3c   :  { %2481 = vmatpush3.bf16.msra.mxu0 %v2777_v55  ;;  %2509 = vmatpush3.bf16.msra.mxu1 %v2779_v57 }
  0x3d   :  { %2482 = vmatprep.subr.bf16.mxu0 %v2780_v58  ;;  %2510 = vmatprep.subr.bf16.mxu1 %v2782_v60 }
  0x40   :  { %2483 = vmatpush3.bf16.msra.mxu0 %v2781_v59  ;;  %2511 = vmatpush3.bf16.msra.mxu1 %v2783_v61 }
  0x41   :  { %2484 = vmatprep.subr.bf16.mxu0 %v2784_v62  ;;  %2512 = vmatprep.subr.bf16.mxu1 %v2786_v0 }
  0x42   :  { %2660 = vmatmul.mubr.msk.bf16.gmra.mrb[28].mxu0 %vm105_vm2, %v2757_v36  ;;  %2680 = vmatmul.mubr.msk.bf16.gmra.mrb[28].mxu1 %vm105_vm2, %v2759_v37 }
  0x44   :  { %2485 = vmatpush3.bf16.msra.mxu0 %v2785_v63  ;;  %2513 = vmatpush3.bf16.msra.mxu1 %v2787_v1 }
  0x45   :  { %2486 = vmatprep.subr.bf16.mxu0 %v2788_v2  ;;  %2514 = vmatprep.subr.bf16.mxu1 %v2790_v4 }
  0x48   :  { %2487 = vmatpush3.bf16.msra.mxu0 %v2789_v3  ;;  %2515 = vmatpush3.bf16.msra.mxu1 %v2791_v5 }
  0x49   :  { %2528 = vmatprep.subr.bf16.mxu0 %v2792_v6  ;;  %2556 = vmatprep.subr.bf16.mxu1 %v2798_v7 }
  0xdd   :  { %v2609_v9 = vpop.f32.mrb[0].mxu0  ;;  %v2629_v10 = vpop.f32.mrb[0].mxu1 }
  0xde   :  { %v180_v11 = vadd.f32 %v2609_v9, %v3122_v8  ;;  %v171_v12 = vpop.f32.mrb[1].mxu0  ;;  %v414_v13 = vadd.f32 %v2629_v10, %v3122_v8  ;;  %v405_v14 = vpop.f32.mrb[1].mxu1 }
  0xdf   :  { %v172_v15 = vadd.f32 %v3122_v8, %v171_v12  ;;  %v2610_v16 = vpop.f32.mrb[2].mxu0  ;;  %v406_v17 = vadd.f32 %v3122_v8, %v405_v14  ;;  %v2630_v18 = vpop.f32.mrb[2].mxu1 }
  0xe0   :  { %v183_v19 = vadd.f32 %v2610_v16, %v3122_v8  ;;  %v174_v20 = vpop.f32.mrb[3].mxu0  ;;  %v470_v21 = vmax.f32 %v414_v13, 0.0  ;;  %v417_v22 = vadd.f32 %v2630_v18, %v3122_v8  ;;  %v408_v23 = vpop.f32.mrb[3].mxu1  ;;  %v236_v27 = vmax.f32 %v180_v11, 0.0 }
  0xe1   :  { %v175_v24 = vadd.f32 %v3122_v8, %v174_v20  ;;  %v468_v25 = vmax.f32 %v406_v17, 0.0  ;;  %v409_v26 = vadd.f32 %v3122_v8, %v408_v23  ;;  %v234_v30 = vmax.f32 %v172_v15, 0.0 }
  0xe2   :  { %v237_v28 = vmax.f32 %v183_v19, 0.0  ;;  %v471_v29 = vmax.f32 %v417_v22, 0.0 }
  0xe3   :  { %v235_v31 = vmax.f32 %v175_v24, 0.0  ;;  %v469_v32 = vmax.f32 %v409_v26, 0.0 }
  0xe4   :  { %v251_v33 = vmax.f32 %v236_v27, %v237_v28  ;;  %v485_v34 = vmax.f32 %v470_v21, %v471_v29 }
  0xe5   :  { %v250_v35 = vmax.f32 %v234_v30, %v235_v31  ;;  %v2613_v36 = vpop.f32.mrb[4].mxu0  ;;  %v484_v37 = vmax.f32 %v468_v25, %v469_v32  ;;  %v2633_v38 = vpop.f32.mrb[4].mxu1 }
  0xe6   :  { %v267_v39 = vrot.slane %v251_v33, 1  ;;  %v196_v40 = vadd.f32 %v2613_v36, %v3122_v8  ;;  %v187_v41 = vpop.f32.mrb[5].mxu0  ;;  %v501_v42 = vrot.slane %v485_v34, 1  ;;  %v3134_v43 = vadd.f32 %v2633_v38, %v3122_v8  ;;  %v421_v44 = vpop.f32.mrb[5].mxu1 }
  0xe7   :  { %v266_v45 = vrot.slane %v250_v35, 1  ;;  %v188_v46 = vadd.f32 %v3122_v8, %v187_v41  ;;  %v2614_v47 = vpop.f32.mrb[6].mxu0  ;;  %v500_v48 = vrot.slane %v484_v37, 1  ;;  %v3138_v49 = vadd.f32 %v3122_v8, %v421_v44  ;;  %v3140_v50 = vpop.f32.mrb[6].mxu1 }
  0xe8   :  { %v283_v51 = vmax.f32 %v251_v33, %v267_v39  ;;  %v240_v52 = vmax.f32 %v196_v40, 0.0  ;;  %v199_v53 = vadd.f32 %v2614_v47, %v3122_v8  ;;  %v190_v54 = vpop.f32.mrb[7].mxu0  ;;  %v3143_v55 = vmax.f32 %v485_v34, %v501_v42  ;;  %v424_v56 = vpop.f32.mrb[7].mxu1 }
  0xe9   :  { %v282_v57 = vmax.f32 %v250_v35, %v266_v45  ;;  %v238_v58 = vmax.f32 %v188_v46, 0.0  ;;  %v191_v59 = vadd.f32 %v3122_v8, %v190_v54  ;;  %v3146_v60 = vmax.f32 %v484_v37, %v500_v48 }
  0xea   :  { %v1000_v61 = vrot.slane %v283_v51, 7  ;;  %v1023_v62 = vrot.slane %v283_v51, 1  ;;  %v1078_v63 = vrot.slane %v283_v51, 3  ;;  %v1110_v0 = vrot.slane %v283_v51, 5 }
  0xeb   :  { %v1022_v1 = vrot.slane %v282_v57, 2  ;;  %v1077_v2 = vrot.slane %v282_v57, 4  ;;  %v1109_v3 = vrot.slane %v282_v57, 6  ;;  %v241_v4 = vmax.f32 %v199_v53, 0.0 }
  0xec   :  { %v1002_v5 = vsel %vm1001_vm3, %v1000_v61, %v282_v57  ;;  %v239_v6 = vmax.f32 %v191_v59, 0.0  ;;  %v1045_v7 = vrot.slane %v3143_v55, 7  ;;  %v1061_v9 = vrot.slane %v3143_v55, 1 }
  0xed   :  { %v3152_v10 = vsel %vm1001_vm3, %v1078_v63, %v1077_v2  ;;  %v1111_v11 = vsel %vm1001_vm3, %v1110_v0, %v1109_v3  ;;  %v253_v12 = vmax.f32 %v240_v52, %v241_v4  ;;  %v1024_v13 = vsel %vm1001_vm3, %v1023_v62, %v1022_v1  ;;  %v2617_v14 = vpop.f32.mrb[8].mxu0  ;;  %v2637_v15 = vpop.f32.mrb[8].mxu1 }
  0xee   :  { %v252_v16 = vmax.f32 %v238_v58, %v239_v6  ;;  %v1093_v17 = vrot.slane %v3143_v55, 3  ;;  %v1125_v18 = vrot.slane %v3143_v55, 5  ;;  %v3160_v19 = vsel %vm1001_vm3, %v1045_v7, %v3146_v60  ;;  %v203_v20 = vpop.f32.mrb[9].mxu0  ;;  %v437_v21 = vpop.f32.mrb[9].mxu1 }
  0xef   :  { %v269_v22 = vrot.slane %v253_v12, 1  ;;  %v1060_v23 = vrot.slane %v3146_v60, 2  ;;  %v1092_v24 = vrot.slane %v3146_v60, 4  ;;  %v1124_v25 = vrot.slane %v3146_v60, 6  ;;  %v2618_v26 = vpop.f32.mrb[10].mxu0  ;;  %v2638_v27 = vpop.f32.mrb[10].mxu1 }
  0xf0   :  { %v268_v28 = vrot.slane %v252_v16, 1  ;;  %v212_v29 = vadd.f32 %v2617_v14, %v3122_v8  ;;  %v474_v30 = vmax.f32 %v3134_v43, 0.0  ;;  %v204_v31 = vadd.f32 %v3122_v8, %v203_v20  ;;  %v206_v32 = vpop.f32.mrb[11].mxu0  ;;  %v440_v33 = vpop.f32.mrb[11].mxu1 }
  0xf1   :  { %v3168_v34 = vmax.f32 %v253_v12, %v269_v22  ;;  %v3171_v35 = vsel %vm1001_vm3, %v1093_v17, %v1092_v24  ;;  %v3174_v36 = vsel %vm1001_vm3, %v1125_v18, %v1124_v25  ;;  %v472_v37 = vmax.f32 %v3138_v49, 0.0 }
  0xf2   :  { %v3177_v38 = vmax.f32 %v252_v16, %v268_v28  ;;  %v244_v39 = vmax.f32 %v212_v29, 0.0  ;;  %v242_v40 = vmax.f32 %v204_v31, 0.0  ;;  %v215_v41 = vadd.f32 %v2618_v26, %v3122_v8 }
  0xf3   :  { %v1006_v42 = vrot.slane %v3168_v34, 5  ;;  %v1026_v43 = vrot.slane %v3168_v34, 7  ;;  %v1082_v44 = vrot.slane %v3168_v34, 1  ;;  %v433_v52 = vadd.f32 %v3140_v50, %v3122_v8 }
  0xf4   :  { %v1003_v46 = vrot.slane %v3177_v38, 6  ;;  %v3187_v47 = vsel %vm1004_vm4, %v3177_v38, %v1024_v13  ;;  %v1080_v48 = vrot.slane %v3177_v38, 2  ;;  %v1112_v49 = vrot.slane %v3177_v38, 4 }
  0xf5   :  { %v245_v51 = vmax.f32 %v215_v41, 0.0  ;;  %v207_v53 = vadd.f32 %v3122_v8, %v206_v32  ;;  %v425_v54 = vadd.f32 %v3122_v8, %v424_v56  ;;  %v2621_v55 = vpop.f32.mrb[12].mxu0  ;;  %v2641_v57 = vpop.f32.mrb[12].mxu1  ;;  %v1062_v60 = vsel %vm1001_vm3, %v1061_v9, %v1060_v23 }
  0xf6   :  { %v3196_v58 = vsel %vm1004_vm4, %v1003_v46, %v1002_v5  ;;  %v3199_v59 = vsel %vm1004_vm4, %v1112_v49, %v1111_v11  ;;  %v446_v61 = vadd.f32 %v2637_v15, %v3122_v8  ;;  %v219_v62 = vpop.f32.mrb[13].mxu0  ;;  %v453_v63 = vpop.f32.mrb[13].mxu1  ;;  %v475_v50 = vmax.f32 %v433_v52, 0.0 }
  0xf7   :  { %v255_v0 = vmax.f32 %v244_v39, %v245_v51  ;;  %v243_v1 = vmax.f32 %v207_v53, 0.0  ;;  %v473_v2 = vmax.f32 %v425_v54, 0.0  ;;  %v2622_v3 = vpop.f32.mrb[14].mxu0  ;;  %v3203_v56 = vpop.f32.mrb[14].mxu1  ;;  %v438_v5 = vadd.f32 %v3122_v8, %v437_v21 }
  0xf8   :  { %v478_v4 = vmax.f32 %v446_v61, 0.0  ;;  %v449_v6 = vadd.f32 %v2638_v27, %v3122_v8  ;;  %v441_v7 = vadd.f32 %v3122_v8, %v440_v33  ;;  %v3208_v11 = vpop.f32.mrb[15].mxu0  ;;  %v3210_v9 = vpop.f32.mrb[15].mxu1  ;;  %v487_v13 = vmax.f32 %v474_v30, %v475_v50 }
  0xf9   :  { %v271_v12 = vrot.slane %v255_v0, 1  ;;  %v254_v14 = vmax.f32 %v242_v40, %v243_v1  ;;  %v486_v15 = vmax.f32 %v472_v37, %v473_v2  ;;  %v476_v16 = vmax.f32 %v438_v5, 0.0 }
  0xfa   :  { %v479_v17 = vmax.f32 %v449_v6, 0.0  ;;  %v477_v18 = vmax.f32 %v441_v7, 0.0  ;;  %v3213_v20 = vadd.f32 %v2621_v55, %v3122_v8  ;;  %v503_v21 = vrot.slane %v487_v13, 1 }
  0xfb   :  { %v3215_v22 = vmax.f32 %v255_v0, %v271_v12  ;;  %v270_v23 = vrot.slane %v254_v14, 1  ;;  %v502_v24 = vrot.slane %v486_v15, 1  ;;  %v3219_v28 = vadd.f32 %v2641_v57, %v3122_v8 }
  0xfc   :  { %v489_v25 = vmax.f32 %v478_v4, %v479_v17  ;;  %v488_v26 = vmax.f32 %v476_v16, %v477_v18  ;;  %v248_v27 = vmax.f32 %v3213_v20, 0.0  ;;  %v3227_v39 = vmax.f32 %v487_v13, %v503_v21 }
  0xfd   :  { %v1012_v29 = vrot.slane %v3215_v22, 3  ;;  %v1030_v30 = vrot.slane %v3215_v22, 5  ;;  %v2649_v33 = vpop.f32.mrb[16].mxu0  ;;  %v3225_v37 = vpop.f32.mrb[16].mxu1  ;;  %v3229_v40 = vmax.f32 %v254_v14, %v270_v23  ;;  %v3231_v41 = vmax.f32 %v486_v15, %v502_v24 }
  0xfe   :  { %v505_v46 = vrot.slane %v489_v25, 1  ;;  %v639_v49 = vpop.f32.mrb[17].mxu0  ;;  %v3233_v51 = vpop.f32.mrb[17].mxu1  ;;  %v504_v52 = vrot.slane %v488_v26, 1  ;;  %v482_v53 = vmax.f32 %v3219_v28, 0.0  ;;  %v220_v54 = vadd.f32 %v3122_v8, %v219_v62 }
  0xff   :  { %v454_v55 = vadd.f32 %v3122_v8, %v453_v63  ;;  %v2650_v57 = vpop.f32.mrb[18].mxu0  ;;  %v3238_v61 = vpop.f32.mrb[18].mxu1  ;;  %v1009_v6 = vrot.slane %v3229_v40, 4  ;;  %v1028_v62 = vrot.slane %v3229_v40, 6  ;;  %v3252_v12 = vsel %vm1004_vm4, %v3231_v41, %v1062_v60 }
 0x100   :  { %v642_v4 = vpop.f32.mrb[19].mxu0  ;;  %v3244_v5 = vpop.f32.mrb[19].mxu1  ;;  %v3256_v15 = vmax.f32 %v489_v25, %v505_v46  ;;  %v3258_v16 = vmax.f32 %v488_v26, %v504_v52  ;;  %v246_v17 = vmax.f32 %v220_v54, 0.0  ;;  %v231_v20 = vadd.f32 %v2622_v3, %v3122_v8 }
 0x101   :  { %v480_v18 = vmax.f32 %v454_v55, 0.0  ;;  %v465_v3 = vadd.f32 %v3203_v56, %v3122_v8  ;;  %v223_v54 = vadd.f32 %v3122_v8, %v3208_v11  ;;  %v457_v55 = vadd.f32 %v3122_v8, %v3210_v9 }
 0x102   :  { %v249_v26 = vmax.f32 %v231_v20, 0.0  ;;  %v648_v60 = vadd.f32 %v2649_v33, %v3122_v8  ;;  %v640_v20 = vadd.f32 %v3122_v8, %v639_v49  ;;  %v651_v1 = vadd.f32 %v2650_v57, %v3122_v8 }
 0x103   :  { %v643_v13 = vadd.f32 %v3122_v8, %v642_v4  ;;  %v483_v11 = vmax.f32 %v465_v3, 0.0  ;;  %v247_v2 = vmax.f32 %v223_v54, 0.0  ;;  %v481_v9 = vmax.f32 %v457_v55, 0.0 }
 0x104   :  { %v257_v25 = vmax.f32 %v248_v27, %v249_v26  ;;  %v704_v21 = vmax.f32 %v648_v60, 0.0  ;;  %v702_v0 = vmax.f32 %v640_v20, 0.0  ;;  %v705_v27 = vmax.f32 %v651_v1, 0.0 }
 0x105   :  { %v2653_v46 = vpop.f32.mrb[20].mxu0  ;;  %v3268_v52 = vpop.f32.mrb[20].mxu1  ;;  %v703_v26 = vmax.f32 %v643_v13, 0.0  ;;  %v491_v49 = vmax.f32 %v482_v53, %v483_v11  ;;  %v256_v7 = vmax.f32 %v246_v17, %v247_v2  ;;  %v490_v57 = vmax.f32 %v480_v18, %v481_v9 }
 0x106   :  { %v655_v14 = vpop.f32.mrb[21].mxu0  ;;  %v3277_v24 = vpop.f32.mrb[21].mxu1  ;;  %v273_v28 = vrot.slane %v257_v25, 1  ;;  %v664_v4 = vadd.f32 %v2653_v46, %v3122_v8  ;;  %v719_v31 = vmax.f32 %v704_v21, %v705_v27  ;;  %v1008_v9 = vsel %vm1007_vm5, %v1006_v42, %v3196_v58 }
 0x107   :  { %v2654_v56 = vpop.f32.mrb[22].mxu0  ;;  %v3282_v23 = vpop.f32.mrb[22].mxu1  ;;  %v718_v3 = vmax.f32 %v702_v0, %v703_v26  ;;  %v656_v54 = vadd.f32 %v3122_v8, %v655_v14  ;;  %v507_v60 = vrot.slane %v491_v49, 1  ;;  %v272_v55 = vrot.slane %v256_v7, 1 }
 0x108   :  { %v658_v33 = vpop.f32.mrb[23].mxu0  ;;  %v3284_v50 = vpop.f32.mrb[23].mxu1  ;;  %v3287_v32 = vmax.f32 %v257_v25, %v273_v28  ;;  %v506_v63 = vrot.slane %v490_v57, 1  ;;  %v708_v45 = vmax.f32 %v664_v4, 0.0  ;;  %v735_v20 = vrot.slane %v719_v31, 1 }
 0x109   :  { %v734_v1 = vrot.slane %v718_v3, 1  ;;  %v706_v13 = vmax.f32 %v656_v54, 0.0  ;;  %v667_v53 = vadd.f32 %v2654_v56, %v3122_v8  ;;  %v3295_v18 = vmax.f32 %v491_v49, %v507_v60 }
 0x10a   :  { %v3297_v0 = vmax.f32 %v256_v7, %v272_v55  ;;  %v3299_v14 = vmax.f32 %v490_v57, %v506_v63  ;;  %v659_v21 = vadd.f32 %v3122_v8, %v658_v33  ;;  %v751_v46 = vmax.f32 %v719_v31, %v735_v20 }
 0x10b   :  { %v750_v11 = vmax.f32 %v718_v3, %v734_v1  ;;  %v709_v56 = vmax.f32 %v667_v53, 0.0  ;;  %v1011_v33 = vsel %vm1010_vm6, %v1009_v6, %v1008_v9  ;;  %v1018_v31 = vrot.slane %v3287_v32, 1 }
 0x10c   :  { %v1015_v63 = vrot.slane %v3297_v0, 2  ;;  %v707_v26 = vmax.f32 %v659_v21, 0.0  ;;  %v1149_v4 = vrot.slane %v751_v46, 7  ;;  %v1165_v3 = vrot.slane %v751_v46, 1 }
 0x10d   :  { %v3291_v2 = vpop.f32.mrb[24].mxu0  ;;  %v3293_v17 = vpop.f32.mrb[24].mxu1  ;;  %v1181_v42 = vrot.slane %v751_v46, 3  ;;  %v1197_v58 = vrot.slane %v751_v46, 5  ;;  %v1164_v54 = vrot.slane %v750_v11, 2  ;;  %v1180_v60 = vrot.slane %v750_v11, 4 }
 0x10e   :  { %v3302_v28 = vpop.f32.mrb[25].mxu0  ;;  %v3304_v25 = vpop.f32.mrb[25].mxu1  ;;  %v1196_v55 = vrot.slane %v750_v11, 6  ;;  %v721_v20 = vmax.f32 %v708_v45, %v709_v56  ;;  %v3324_v1 = vsel %vm1001_vm3, %v1149_v4, %v750_v11  ;;  %v720_v53 = vmax.f32 %v706_v13, %v707_v26 }
 0x10f   :  { %v3310_v27 = vpop.f32.mrb[26].mxu0  ;;  %v3312_v7 = vpop.f32.mrb[26].mxu1  ;;  %v1014_v6 = vsel %vm1013_vm7, %v1012_v29, %v1011_v33  ;;  %v1027_v21 = vsel %vm1007_vm5, %v1026_v43, %v3187_v47  ;;  %v3334_v9 = vsel %vm1001_vm3, %v1181_v42, %v1180_v60  ;;  %v1166_v11 = vsel %vm1001_vm3, %v1165_v3, %v1164_v54 }
 0x110   :  { %v3319_v49 = vpop.f32.mrb[27].mxu0  ;;  %v3321_v57 = vpop.f32.mrb[27].mxu1  ;;  %v3337_v46 = vsel %vm1001_vm3, %v1197_v58, %v1196_v55  ;;  %v737_v45 = vrot.slane %v721_v20, 1  ;;  %v736_v56 = vrot.slane %v720_v53, 1  ;;  %v1017_v13 = vsel %vm1016_vm8, %v1015_v63, %v1014_v6 }
 0x111   :  { %v1029_v29 = vsel %vm1010_vm6, %v1028_v62, %v1027_v21  ;;  %v1032_v26 = vrot.slane %v3297_v0, 4  ;;  %v1020_v4 = vsel %vm1019_vm9, %v1018_v31, %v1017_v13  ;;  %v1034_v63 = vrot.slane %v3287_v32, 3 }
 0x112   :  { %v3349_v47 = vmax.f32 %v721_v20, %v737_v45  ;;  %v1031_v3 = vsel %vm1013_vm7, %v1030_v30, %v1029_v29  ;;  %v3360_v62 = vmax.f32 %v720_v53, %v736_v56  ;;  %v1081_v60 = vsel %vm1004_vm4, %v1080_v48, %v3152_v10 }
 0x113   :  { %v1033_v54 = vsel %vm1016_vm8, %v1032_v26, %v1031_v3  ;;  %v1087_v31 = vrot.slane %v3297_v0, 6  ;;  %v1083_v26 = vsel %vm1007_vm5, %v1082_v44, %v1081_v60  ;;  %v1089_v3 = vrot.slane %v3287_v32, 5 }
 0x114   :  { %v1168_v6 = vrot.slane %v3349_v47, 7  ;;  %v1151_v10 = vrot.slane %v3360_v62, 6  ;;  %v3383_v38 = vsel %vm1004_vm4, %v3360_v62, %v1166_v11  ;;  %v1035_v29 = vsel %vm1019_vm9, %v1034_v63, %v1033_v54 }
 0x115   :  { %v3345_v33 = vpop.f32.mrb[28].mxu0  ;;  %v3347_v43 = vpop.f32.mrb[28].mxu1  ;;  %v3880_v21 = vrot.slane %v3168_v34, 3  ;;  %v1075_v20 = vpack.c.bf16 %v1035_v29, %v1020_v4  ;;  %v1084_v11 = vsel %vm1010_vm6, %v3229_v40, %v1083_v26  ;;  %v3881_v48 = vrot.slane %v3229_v40, 2 }
 0x116   :  { %v3356_v42 = vpop.f32.mrb[29].mxu0  ;;  %v3358_v58 = vpop.f32.mrb[29].mxu1  ;;  %v1121_v63 = vrot.slane %v3287_v32, 7  ;;  %v3882_v54 = vrot.slane %v3215_v22, 7  ;;  %v3883_v60 = vrot.slane %v3215_v22, 1  ;;  %v1057_v22 = vrot.slane %v3295_v18, 1 }
 0x117   :  { %v3368_v55 = vpop.f32.mrb[30].mxu0  ;;  %v3370_v30 = vpop.f32.mrb[30].mxu1  ;;  %v1115_v53 = vsel %vm1007_vm5, %v3880_v21, %v3199_v59  ;;  %v3884_v59 = vrot.slane %v3231_v41, 6  ;;  %v1055_v21 = vrot.slane %v3299_v14, 2 }
 0x118   :  { %v3376_v45 = vpop.f32.mrb[31].mxu0  ;;  %v3378_v56 = vpop.f32.mrb[31].mxu1  ;;  %v1117_v13 = vsel %vm1010_vm6, %v3881_v48, %v1115_v53  ;;  %v1086_v44 = vsel %vm1013_vm7, %v3882_v54, %v1084_v11  ;;  %v3885_v53 = vrot.slane %v3227_v39, 5  ;;  %v3886_v11 = vrot.slane %v3258_v16, 4 }
 0x119   :  { %v1119_v34 = vsel %vm1013_vm7, %v3883_v60, %v1117_v13  ;;  %v1048_v4 = vsel %vm1004_vm4, %v3884_v59, %v3160_v19  ;;  %v1088_v40 = vsel %vm1016_vm8, %v1087_v31, %v1086_v44  ;;  %v3887_v31 = vrot.slane %v3227_v39, 7 }
 0x11a   :  { %v1120_v32 = vsel %vm1016_vm8, %v3297_v0, %v1119_v34  ;;  %v1050_v48 = vsel %vm1007_vm5, %v3885_v53, %v1048_v4  ;;  %v1090_v13 = vsel %vm1019_vm9, %v1089_v3, %v1088_v40  ;;  %v3888_v60 = vrot.slane %v3256_v15, 3  ;;  %v2794_v53 = vld [vmem:[%s3874_s3 + $0x148] sm:$0xff]  }
 0x11b   :  { %v1122_v26 = vsel %vm1019_vm9, %v1121_v63, %v1120_v32  ;;  %v1052_v19 = vsel %vm1010_vm6, %v3886_v11, %v1050_v48  ;;  %v1065_v54 = vsel %vm1007_vm5, %v3887_v31, %v3252_v12  ;;  %v1107_v0 = vpack.c.bf16 %v1090_v13, %v1035_v29  ;;  %v2793_v63 = vld [vmem:[%s3874_s3 + $0x100] sm:$0xff]  }
 0x11c   :  { %v1139_v44 = vpack.c.bf16 %v1122_v26, %v1090_v13  ;;  %v1054_v34 = vsel %vm1013_vm7, %v3888_v60, %v1052_v19  ;;  %v3889_v59 = vrot.slane %v3258_v16, 6  ;;  %v3890_v40 = vrot.slane %v3256_v15, 5 }
 0x11d   :  { %v1056_v4 = vsel %vm1016_vm8, %v1055_v21, %v1054_v34  ;;  %v1070_v29 = vrot.slane %v3299_v14, 4  ;;  %v1072_v32 = vrot.slane %v3295_v18, 3  ;;  %1898 = vmatprep.mubr.bf16.mxu0 %v1107_v0  ;;  %v3891_v13 = vrot.slane %v3231_v41, 2 }
 0x11e   :  { %v1067_v3 = vsel %vm1010_vm6, %v3889_v59, %v1065_v54  ;;  %v1058_v48 = vsel %vm1019_vm9, %v1057_v22, %v1056_v4  ;;  %v1102_v26 = vrot.slane %v3299_v14, 6  ;;  %v1104_v11 = vrot.slane %v3295_v18, 5  ;;  %1899 = vmatmul.mubr.bf16.vlgmr.msra.gmra.mrb[32].mxu0 %v1075_v20  ;;  %v2795_v20 = vld [vmem:[%s3874_s3 + $0x108] sm:$0xff]  }
 0x11f   :  { %v1069_v12 = vsel %vm1013_vm7, %v3890_v40, %v1067_v3  ;;  %v1096_v21 = vsel %vm1004_vm4, %v3891_v13, %v3171_v35  ;;  %v3892_v31 = vrot.slane %v3227_v39, 1  ;;  %v680_v0 = vadd.f32 %v3291_v2, %v3122_v8  ;;  %2529 = vmatpush3.bf16.msra.mxu0 %v2793_v63  ;;  %v2796_v40 = vld [vmem:[%s3874_s3 + $0x150] sm:$0xff]  }
 0x120   :  { %v1071_v19 = vsel %vm1016_vm8, %v1070_v29, %v1069_v12  ;;  %v672_v22 = vadd.f32 %v3122_v8, %v3302_v28  ;;  %v882_v34 = vadd.f32 %v3225_v37, %v3122_v8  ;;  %v683_v59 = vadd.f32 %v3310_v27, %v3122_v8  ;;  %2530 = vmatprep.subr.bf16.mxu0 %v2794_v53  ;;  %v2799_v37 = vld [vmem:[%s3874_s3 + $0x180] sm:$0xff]   ;;  %v2802_v53 = vld [vmem:[%s3874_s3 + $0x1c8] sm:$0xff]  }
 0x121   :  { %v1098_v54 = vsel %vm1007_vm5, %v3892_v31, %v1096_v21  ;;  %v1073_v60 = vsel %vm1019_vm9, %v1072_v32, %v1071_v19  ;;  %v3893_v3 = vrot.slane %v3256_v15, 7  ;;  %v712_v4 = vmax.f32 %v680_v0, 0.0 }
 0x122   :  { %v1099_v35 = vsel %vm1010_vm6, %v3258_v16, %v1098_v54  ;;  %v1076_v2 = vpack.c.bf16 %v1073_v60, %v1058_v48  ;;  %v710_v63 = vmax.f32 %v672_v22, 0.0  ;;  %v938_v29 = vmax.f32 %v882_v34, 0.0 }
 0x123   :  { %v1101_v28 = vsel %vm1013_vm7, %v3893_v3, %v1099_v35  ;;  %v713_v27 = vmax.f32 %v683_v59, 0.0  ;;  %v874_v32 = vadd.f32 %v3122_v8, %v3233_v51  ;;  %v675_v13 = vadd.f32 %v3122_v8, %v3319_v49  ;;  %2531 = vmatpush3.bf16.msra.mxu0 %v2795_v20  ;;  %v2797_v49 = vld [vmem:[%s3874_s3 + $0x110] sm:$0xff]  }
 0x124   :  { %v1103_v12 = vsel %vm1016_vm8, %v1102_v26, %v1101_v28  ;;  %1947 = vmatprep.mubr.bf16.mxu1 %v1076_v2  ;;  %v885_v21 = vadd.f32 %v3238_v61, %v3122_v8  ;;  %v877_v26 = vadd.f32 %v3122_v8, %v3244_v5  ;;  %2532 = vmatprep.subr.bf16.mxu0 %v2796_v40  ;;  %v3894_v35 = vrot.slane %v3231_v41, 4  ;;  %v2806_v20 = vld [vmem:[%s3874_s3 + $0x1d0] sm:$0xff]  }
 0x125   :  { %v3488_v48 = vsel %vm1019_vm9, %v1104_v11, %v1103_v12  ;;  %1948 = vmatmul.mubr.bf16.vlgmr.msra.gmra.mrb[32].mxu1 %v1139_v44  ;;  %v723_v19 = vmax.f32 %v712_v4, %v713_v27  ;;  %v936_v31 = vmax.f32 %v874_v32, 0.0  ;;  %v3501_v11 = vadd.f32 %v3268_v52, %v3122_v8  ;;  %v2800_v44 = vld [vmem:[%s3874_s3 + $0x158] sm:$0xff]   ;;  %v2803_v52 = vld [vmem:[%s3874_s3 + $0x188] sm:$0xff]  }
 0x126   :  { %v3497_v51 = vpack.c.bf16 %v3488_v48, %v1073_v60  ;;  %v711_v54 = vmax.f32 %v675_v13, 0.0  ;;  %v939_v61 = vmax.f32 %v885_v21, 0.0  ;;  %v937_v0 = vmax.f32 %v877_v26, 0.0  ;;  %2557 = vmatpush3.bf16.msra.mxu1 %v2799_v37  ;;  %v2810_v21 = vld [vmem:[%s3874_s3 + $0x1d8] sm:$0xff]  }
 0x127   :  { %v3508_v5 = vadd.f32 %v3122_v8, %v3277_v24  ;;  %v739_v22 = vrot.slane %v723_v19, 1  ;;  %v942_v60 = vmax.f32 %v3501_v11, 0.0  ;;  %v1128_v24 = vsel %vm1004_vm4, %v3894_v35, %v3174_v36  ;;  %2558 = vmatprep.subr.bf16.mxu1 %v2802_v53  ;;  %2533 = vmatpush3.bf16.msra.mxu0 %v2797_v49 }
 0x128   :  { %1906 = vmatprep.mubr.bf16.mxu0 %v3497_v51  ;;  %v1136_v34 = vrot.slane %v3295_v18, 7  ;;  %v722_v59 = vmax.f32 %v710_v63, %v711_v54  ;;  %v953_v3 = vmax.f32 %v938_v29, %v939_v61  ;;  %v952_v28 = vmax.f32 %v936_v31, %v937_v0  ;;  %2534 = vmatprep.subr.bf16.mxu0 %v2800_v44 }
 0x129   :  { %1907 = vmatmul.mubr.bf16.gmra.mrb[36].mxu0 %v1076_v2  ;;  %v940_v4 = vmax.f32 %v3508_v5, 0.0  ;;  %v3527_v40 = vmax.f32 %v723_v19, %v739_v22  ;;  %v3895_v41 = vrot.slane %v3227_v39, 3  ;;  %v901_v18 = vadd.f32 %v3282_v23, %v3122_v8  ;;  %v2801_v2 = vld [vmem:[%s3874_s3 + $0x118] sm:$0xff]   ;;  %v2804_v23 = vld [vmem:[%s3874_s3 + $0x160] sm:$0xff]  }
 0x12a   :  { %v3536_v37 = vadd.f32 %v3345_v33, %v3122_v8  ;;  %v738_v63 = vrot.slane %v722_v59, 1  ;;  %v969_v12 = vrot.slane %v953_v3, 1  ;;  %v968_v29 = vrot.slane %v952_v28, 1  ;;  %2559 = vmatpush3.bf16.msra.mxu1 %v2803_v52  ;;  %v2807_v33 = vld [vmem:[%s3874_s3 + $0x190] sm:$0xff]   ;;  %v2805_v52 = vld [vmem:[%s3874_s3 + $0x120] sm:$0xff]  }
 0x12b   :  { %v1130_v36 = vsel %vm1007_vm5, %v3895_v41, %v1128_v24  ;;  %v3896_v27 = vrot.slane %v3258_v16, 2  ;;  %v1157_v32 = vrot.slane %v3527_v40, 3  ;;  %v1172_v53 = vrot.slane %v3527_v40, 5  ;;  %2560 = vmatprep.subr.bf16.mxu1 %v2806_v20  ;;  %2535 = vmatpush3.bf16.msra.mxu0 %v2801_v2 }
 0x12c   :  { %v1188_v13 = vrot.slane %v3527_v40, 7  ;;  %v1205_v16 = vrot.slane %v3527_v40, 1  ;;  %v3557_v26 = vmax.f32 %v722_v59, %v738_v63  ;;  %v985_v19 = vmax.f32 %v953_v3, %v969_v12  ;;  %2536 = vmatprep.subr.bf16.mxu0 %v2804_v23  ;;  %v2814_v63 = vld [vmem:[%s3874_s3 + $0x1e0] sm:$0xff]   ;;  %v2809_v23 = vld [vmem:[%s3874_s3 + $0x128] sm:$0xff]  }
 0x12d   :  { %v1132_v39 = vsel %vm1010_vm6, %v3896_v27, %v1130_v36  ;;  %v984_v31 = vmax.f32 %v952_v28, %v968_v29  ;;  %v3897_v11 = vrot.slane %v3256_v15, 1  ;;  %v943_v61 = vmax.f32 %v901_v18, 0.0  ;;  %v2811_v28 = vld [vmem:[%s3874_s3 + $0x198] sm:$0xff]  }
 0x12e   :  { %v716_v0 = vmax.f32 %v3536_v37, 0.0  ;;  %v893_v44 = vadd.f32 %v3122_v8, %v3284_v50  ;;  %v1155_v22 = vrot.slane %v3557_v26, 4  ;;  %v1170_v15 = vrot.slane %v3557_v26, 6  ;;  %2561 = vmatpush3.bf16.msra.mxu1 %v2807_v33  ;;  %v2817_v37 = vld [vmem:[%s3874_s3 + $0x138] sm:$0xff]  }
 0x12f   :  { %v1134_v49 = vsel %vm1013_vm7, %v3897_v11, %v1132_v39  ;;  %v1203_v35 = vrot.slane %v3557_v26, 2  ;;  %v1220_v24 = vrot.slane %v985_v19, 7  ;;  %v1236_v20 = vrot.slane %v985_v19, 1  ;;  %2562 = vmatprep.subr.bf16.mxu1 %v2810_v21  ;;  %2537 = vmatpush3.bf16.msra.mxu0 %v2805_v52 }
 0x130   :  { %v1135_v54 = vsel %vm1016_vm8, %v3299_v14, %v1134_v49  ;;  %v2808_v14 = vld [vmem:[%s3874_s3 + $0x168] sm:$0xff]   ;;  %v1252_v50 = vrot.slane %v985_v19, 3  ;;  %v1268_v59 = vrot.slane %v985_v19, 5  ;;  %v1235_v3 = vrot.slane %v984_v31, 2 }
 0x131   :  { %v3580_v41 = vsel %vm1001_vm3, %v1220_v24, %v984_v31  ;;  %v1251_v36 = vrot.slane %v984_v31, 4  ;;  %v1267_v18 = vrot.slane %v984_v31, 6  ;;  %v1137_v2 = vsel %vm1019_vm9, %v1136_v34, %v1135_v54  ;;  %2538 = vmatprep.subr.bf16.mxu0 %v2808_v14  ;;  %v2813_v24 = vld [vmem:[%s3874_s3 + $0x130] sm:$0xff]  }
 0x132   :  { %v3587_v12 = vpack.c.bf16 %v1137_v2, %v3488_v48  ;;  %v955_v29 = vmax.f32 %v942_v60, %v943_v61  ;;  %v941_v27 = vmax.f32 %v893_v44, 0.0  ;;  %v1237_v39 = vsel %vm1001_vm3, %v1236_v20, %v1235_v3  ;;  %v2812_v60 = vld [vmem:[%s3874_s3 + $0x170] sm:$0xff]   ;;  %2563 = vmatpush3.bf16.msra.mxu1 %v2811_v28 }
 0x133   :  { %v3594_v33 = vsel %vm1001_vm3, %v1252_v50, %v1251_v36  ;;  %v1269_v34 = vsel %vm1001_vm3, %v1268_v59, %v1267_v18  ;;  %v688_v21 = vadd.f32 %v3122_v8, %v3356_v42  ;;  %v914_v48 = vadd.f32 %v3293_v17, %v3122_v8  ;;  %v2815_v17 = vld [vmem:[%s3874_s3 + $0x1a0] sm:$0xff]   ;;  %2564 = vmatprep.subr.bf16.mxu1 %v2814_v63  ;;  %v2816_v50 = vld [vmem:[%s3874_s3 + $0x178] sm:$0xff]  }
 0x134   :  { %1996 = vmatprep.mubr.bf16.mxu0 %v3587_v12  ;;  %v971_v19 = vrot.slane %v955_v29, 1  ;;  %v954_v31 = vmax.f32 %v940_v4, %v941_v27  ;;  %v699_v11 = vadd.f32 %v3368_v55, %v3122_v8  ;;  %v906_v42 = vadd.f32 %v3122_v8, %v3304_v25  ;;  %v2818_v55 = vld [vmem:[%s3874_s3 + $0x1e8] sm:$0xff]   ;;  %2539 = vmatpush3.bf16.msra.mxu0 %v2809_v23 }
 0x135   :  { %v714_v49 = vmax.f32 %v688_v21, 0.0  ;;  %v946_v54 = vmax.f32 %v914_v48, 0.0  ;;  %v691_v61 = vadd.f32 %v3122_v8, %v3376_v45  ;;  %v917_v5 = vadd.f32 %v3312_v7, %v3122_v8  ;;  %2540 = vmatprep.subr.bf16.mxu0 %v2812_v60 }
 0x136   :  { %v3621_v4 = vmax.f32 %v955_v29, %v971_v19  ;;  %v970_v25 = vrot.slane %v954_v31, 1  ;;  %v717_v44 = vmax.f32 %v699_v11, 0.0  ;;  %v944_v52 = vmax.f32 %v906_v42, 0.0  ;;  %2565 = vmatpush3.bf16.msra.mxu1 %v2815_v17  ;;  %v2821_v29 = vld [vmem:[%s3874_s3 + $0x1f0] sm:$0xff]  }
 0x137   :  { %v715_v14 = vmax.f32 %v691_v61, 0.0  ;;  %v947_v45 = vmax.f32 %v917_v5, 0.0  ;;  %v909_v7 = vadd.f32 %v3122_v8, %v3321_v57  ;;  %v930_v20 = vadd.f32 %v3347_v43, %v3122_v8  ;;  %v2819_v57 = vld [vmem:[%s3874_s3 + $0x1a8] sm:$0xff]   ;;  %2566 = vmatprep.subr.bf16.mxu1 %v2818_v55  ;;  %v2824_v55 = vld [vmem:[%s3874_s3 + $0x1f8] sm:$0xff]  }
 0x138   :  { %v1224_v59 = vrot.slane %v3621_v4, 5  ;;  %v1239_v3 = vrot.slane %v3621_v4, 7  ;;  %v1256_v28 = vrot.slane %v3621_v4, 1  ;;  %v1272_v36 = vrot.slane %v3621_v4, 3  ;;  %2541 = vmatpush3.bf16.msra.mxu0 %v2813_v24 }
 0x139   :  { %v3640_v18 = vmax.f32 %v954_v31, %v970_v25  ;;  %v725_v43 = vmax.f32 %v716_v0, %v717_v44  ;;  %v724_v2 = vmax.f32 %v714_v49, %v715_v14  ;;  %v957_v63 = vmax.f32 %v946_v54, %v947_v45  ;;  %2542 = vmatprep.subr.bf16.mxu0 %v2816_v50  ;;  %v2822_v49 = vld [vmem:[%s3874_s3 + $0x1b0] sm:$0xff]   ;;  %v2823_v45 = vld [vmem:[%s3874_s3 + $0x208] sm:$0xff]  }
 0x13a   :  { %v945_v27 = vmax.f32 %v909_v7, 0.0  ;;  %v950_v23 = vmax.f32 %v930_v20, 0.0  ;;  %v922_v21 = vadd.f32 %v3122_v8, %v3358_v58  ;;  %v933_v48 = vadd.f32 %v3370_v30, %v3122_v8  ;;  %v2820_v58 = vld [vmem:[%s3874_s3 + $0x200] sm:$0xff]   ;;  %2567 = vmatpush3.bf16.msra.mxu1 %v2819_v57 }
 0x13b   :  { %v1222_v0 = vrot.slane %v3640_v18, 6  ;;  %v3657_v60 = vsel %vm1004_vm4, %v3640_v18, %v1237_v39  ;;  %v1254_v19 = vrot.slane %v3640_v18, 2  ;;  %v1270_v31 = vrot.slane %v3640_v18, 4  ;;  %2568 = vmatprep.subr.bf16.mxu1 %v2821_v29 }
 0x13c   :  { %v741_v30 = vrot.slane %v725_v43, 1  ;;  %v740_v11 = vrot.slane %v724_v2, 1  ;;  %v973_v42 = vrot.slane %v957_v63, 1  ;;  %v956_v17 = vmax.f32 %v944_v52, %v945_v27  ;;  %2543 = vmatpush3.bf16.msra.mxu0 %v2817_v37 }
 0x13d   :  { %v3668_v39 = vsel %vm1004_vm4, %v1270_v31, %v1269_v34  ;;  %v948_v54 = vmax.f32 %v922_v21, 0.0  ;;  %v951_v61 = vmax.f32 %v933_v48, 0.0  ;;  %v925_v5 = vadd.f32 %v3122_v8, %v3378_v56  ;;  %2683 = vmatprep.subr.bf16.mxu0 %v2820_v58 }
 0x13e   :  { %v3675_v25 = vmax.f32 %v725_v43, %v741_v30  ;;  %v3677_v44 = vmax.f32 %v724_v2, %v740_v11  ;;  %v3679_v52 = vmax.f32 %v957_v63, %v973_v42  ;;  %v972_v24 = vrot.slane %v956_v17, 1  ;;  %2569 = vmatpush3.bf16.msra.mxu1 %v2822_v49 }
 0x13f   :  { %v959_v34 = vmax.f32 %v950_v23, %v951_v61  ;;  %v949_v14 = vmax.f32 %v925_v5, 0.0  ;;  %v1152_v8 = vsel %vm1004_vm4, %v1151_v10, %v3324_v1  ;;  %v1169_v56 = vsel %vm1007_vm5, %v1168_v6, %v3383_v38  ;;  %v2825_v1 = vld [vmem:[%s3874_s3 + $0x1b8] sm:$0xff]   ;;  %1997 = vmatmul.mubr.bf16.vlgmr.msra.gmra.mrb[40].mxu0 %v3497_v51  ;;  %2570 = vmatprep.subr.bf16.mxu1 %v2824_v55 }
 0x140   :  { %v1228_v7 = vrot.slane %v3679_v52, 3  ;;  %v1243_v20 = vrot.slane %v3679_v52, 5  ;;  %v1259_v50 = vrot.slane %v3679_v52, 7  ;;  %v1276_v57 = vrot.slane %v3679_v52, 1  ;;  %2684 = vmatpush3.bf16.msra.mxu0 %v2820_v58  ;;  %v2831_v52 = vld [vmem:[%s3874_s3 + $0x238] sm:$0xff]  }
 0x141   :  { %v3699_v10 = vmax.f32 %v956_v17, %v972_v24  ;;  %v975_v6 = vrot.slane %v959_v34, 1  ;;  %v958_v38 = vmax.f32 %v948_v54, %v949_v14  ;;  %v3898_v43 = vrot.slane %v3349_v47, 5  ;;  %2685 = vmatprep.subr.bf16.mxu0 %v2823_v45 }
 0x142   :  { %v1159_v29 = vrot.slane %v3677_v44, 2  ;;  %v1161_v27 = vrot.slane %v3675_v25, 1  ;;  %v1171_v23 = vsel %vm1010_vm6, %v1170_v15, %v1169_v56  ;;  %v1174_v58 = vrot.slane %v3677_v44, 4  ;;  %2571 = vmatpush3.bf16.msra.mxu1 %v2825_v1 }
 0x143   :  { %v1154_v2 = vsel %vm1007_vm5, %v3898_v43, %v1152_v8  ;;  %v1226_v21 = vrot.slane %v3699_v10, 4  ;;  %v1241_v48 = vrot.slane %v3699_v10, 6  ;;  %v1274_v51 = vrot.slane %v3699_v10, 2  ;;  %v2827_v43 = vld [vmem:[%s3874_s3 + $0x218] sm:$0xff]  }
 0x144   :  { %v1156_v63 = vsel %vm1010_vm6, %v1155_v22, %v1154_v2  ;;  %v3716_v37 = vmax.f32 %v959_v34, %v975_v6  ;;  %v2826_v22 = vld [vmem:[%s3874_s3 + $0x210] sm:$0xff]   ;;  %v974_v31 = vrot.slane %v958_v38, 1  ;;  %v1173_v15 = vsel %vm1013_vm7, %v1172_v53, %v1171_v23  ;;  %2686 = vmatpush3.bf16.msra.mxu0 %v2823_v45 }
 0x145   :  { %v1158_v30 = vsel %vm1013_vm7, %v1157_v32, %v1156_v63  ;;  %v1176_v42 = vrot.slane %v3675_v25, 3  ;;  %v3899_v17 = vrot.slane %v3360_v62, 2  ;;  %v1190_v54 = vrot.slane %v3677_v44, 6  ;;  %2687 = vmatprep.subr.bf16.mxu0 %v2826_v22 }
 0x146   :  { %v1160_v11 = vsel %vm1016_vm8, %v1159_v29, %v1158_v30  ;;  %v3735_v61 = vmax.f32 %v958_v38, %v974_v31  ;;  %v1175_v53 = vsel %vm1016_vm8, %v1174_v58, %v1173_v15  ;;  %v3900_v5 = vrot.slane %v3349_v47, 1 }
 0x147   :  { %v1184_v49 = vsel %vm1004_vm4, %v3899_v17, %v3334_v9  ;;  %v1162_v32 = vsel %vm1019_vm9, %v1161_v27, %v1160_v11  ;;  %v1177_v24 = vsel %vm1019_vm9, %v1176_v42, %v1175_v53  ;;  %v1192_v9 = vrot.slane %v3675_v25, 5  ;;  %v2832_v17 = vld [vmem:[%s3876_s5] sm:$0xff]   ;;  %v2837_v53 = vld [vmem:[%s3876_s5 + $0x28] sm:$0xff]  }
 0x148   :  { %v1186_v55 = vsel %vm1007_vm5, %v3900_v5, %v1184_v49  ;;  %v3901_v14 = vrot.slane %v3360_v62, 4  ;;  %v1179_v56 = vpack.c.bf16 %v1177_v24, %v1162_v32  ;;  %v3902_v45 = vrot.slane %v3349_v47, 3  ;;  %2688 = vmatpush3.bf16.msra.mxu0 %v2826_v22  ;;  %v2833_v49 = vld [vmem:[%s3876_s5 + $0x8] sm:$0xff]   ;;  %v2836_v32 = vld [vmem:[%s3876_s5 + $0x20] sm:$0xff]   ;;  %v2838_v5 = vld [vmem:[%s3876_s5 + $0x30] sm:$0xff]  }
 0x149   :  { %v1187_v34 = vsel %vm1010_vm6, %v3557_v26, %v1186_v55  ;;  %v1208_v38 = vrot.slane %v3675_v25, 7  ;;  %v1245_v47 = vrot.slane %v3735_v61, 4  ;;  %v1247_v26 = vrot.slane %v3716_v37, 3  ;;  %2689 = vmatprep.subr.bf16.mxu0 %v2827_v43  ;;  %v2839_v55 = vld [vmem:[%s3876_s5 + $0x38] sm:$0xff]  }
 0x14a   :  { %v1200_v8 = vsel %vm1004_vm4, %v3901_v14, %v3337_v46  ;;  %v1189_v1 = vsel %vm1013_vm7, %v1188_v13, %v1187_v34  ;;  %v1240_v13 = vsel %vm1007_vm5, %v1239_v3, %v3657_v60  ;;  %1955 = vmatprep.mubr.bf16.mxu1 %v1179_v56  ;;  %v1255_v40 = vsel %vm1004_vm4, %v1254_v19, %v3594_v33 }
 0x14b   :  { %v1202_v6 = vsel %vm1007_vm5, %v3902_v45, %v1200_v8  ;;  %v1191_v62 = vsel %vm1016_vm8, %v1190_v54, %v1189_v1  ;;  %v1242_v63 = vsel %vm1010_vm6, %v1241_v48, %v1240_v13  ;;  %1956 = vmatmul.mubr.bf16.gmra.mrb[36].mxu1 %v3587_v12  ;;  %v1257_v12 = vsel %vm1007_vm5, %v1256_v28, %v1255_v40  ;;  %v2834_v54 = vld [vmem:[%s3876_s5 + $0x10] sm:$0xff]  }
 0x14c   :  { %v1204_v46 = vsel %vm1010_vm6, %v1203_v35, %v1202_v6  ;;  %v1193_v25 = vsel %vm1019_vm9, %v1192_v9, %v1191_v62  ;;  %v1244_v60 = vsel %vm1013_vm7, %v1243_v20, %v1242_v63  ;;  %v1258_v33 = vsel %vm1010_vm6, %v3699_v10, %v1257_v12  ;;  %2690 = vmatpush3.bf16.msra.mxu0 %v2827_v43  ;;  %v2350_v9 = vld [vmem:[%s3877_s4] ss:$0 sm:$0xff] }
 0x14d   :  { %v1206_v2 = vsel %vm1013_vm7, %v1205_v16, %v1204_v46  ;;  %v1195_v3 = vpack.c.bf16 %v1193_v25, %v1177_v24  ;;  %v2828_v16 = vld [vmem:[%s3874_s3 + $0x220] sm:$0xff]   ;;  %v1246_v27 = vsel %vm1016_vm8, %v1245_v47, %v1244_v60  ;;  %v1263_v19 = vrot.slane %v3716_v37, 5 }
 0x14e   :  { %v1207_v35 = vsel %vm1016_vm8, %v3677_v44, %v1206_v2  ;;  %v1261_v44 = vrot.slane %v3735_v61, 6  ;;  %v1248_v23 = vsel %vm1019_vm9, %v1247_v26, %v1246_v27  ;;  %v1260_v48 = vsel %vm1013_vm7, %v1259_v50, %v1258_v33  ;;  %2691 = vmatprep.subr.bf16.mxu0 %v2828_v16 }
 0x14f   :  { %v1209_v29 = vsel %vm1019_vm9, %v1208_v38, %v1207_v35  ;;  %2045 = vmatprep.mubr.bf16.mxu1 %v1195_v3  ;;  %v1273_v28 = vsel %vm1007_vm5, %v1272_v36, %v3668_v39  ;;  %v1279_v22 = vrot.slane %v3716_v37, 7  ;;  %v1223_v31 = vsel %vm1004_vm4, %v1222_v0, %v3580_v41  ;;  %v2829_v39 = vld [vmem:[%s3874_s3 + $0x228] sm:$0xff]  }
 0x150   :  { %v1211_v20 = vpack.c.bf16 %v1209_v29, %v1193_v25  ;;  %v1262_v30 = vsel %vm1016_vm8, %v1261_v44, %v1260_v48  ;;  %v1275_v15 = vsel %vm1010_vm6, %v1274_v51, %v1273_v28  ;;  %v1225_v50 = vsel %vm1007_vm5, %v1224_v59, %v1223_v31  ;;  %2692 = vmatpush3.bf16.msra.mxu0 %v2828_v16 }
 0x151   :  { %v1230_v36 = vrot.slane %v3735_v61, 2  ;;  %v1264_v18 = vsel %vm1019_vm9, %v1263_v19, %v1262_v30  ;;  %v1277_v41 = vsel %vm1013_vm7, %v1276_v57, %v1275_v15  ;;  %v1227_v0 = vsel %vm1010_vm6, %v1226_v21, %v1225_v50  ;;  %2693 = vmatprep.subr.bf16.mxu0 %v2829_v39  ;;  %v2830_v21 = vld [vmem:[%s3874_s3 + $0x230] sm:$0xff]  }
 0x152   :  { %2004 = vmatprep.mubr.bf16.mxu0 %v1211_v20  ;;  %v1232_v4 = vrot.slane %v3716_v37, 1  ;;  %v1266_v59 = vpack.c.bf16 %v1264_v18, %v1248_v23  ;;  %v1278_v51 = vsel %vm1016_vm8, %v3735_v61, %v1277_v41  ;;  %v1229_v58 = vsel %vm1013_vm7, %v1228_v7, %v1227_v0  ;;  %v2835_v61 = vld [vmem:[%s3876_s5 + $0x18] sm:$0xff]  }
 0x153   :  { %2005 = vmatmul.mubr.bf16.gmra.mrb[44].mxu0 %v1195_v3  ;;  %v1280_v11 = vsel %vm1019_vm9, %v1279_v22, %v1278_v51  ;;  %v1231_v42 = vsel %vm1016_vm8, %v1230_v36, %v1229_v58  ;;  %2046 = vmatmul.mubr.bf16.vlgmr.msra.gmra.mrb[40].mxu1 %v1179_v56  ;;  %v2841_v7 = vmov 0.0  }
 0x154   :  { %2699 = vmatprep.mubr.bf16.mxu0 %v1211_v20  ;;  %v1282_v57 = vpack.c.bf16 %v1280_v11, %v1264_v18  ;;  %v1233_v10 = vsel %vm1019_vm9, %v1232_v4, %v1231_v42  ;;  %2053 = vmatprep.mubr.bf16.mxu1 %v1266_v59 }
 0x155   :  { %v1250_v37 = vpack.c.bf16 %v1248_v23, %v1233_v10  ;;  %2694 = vmatpush3.bf16.msra.mxu0 %v2829_v39  ;;  %2703 = vmatprep.subr.bf16.mxu1 %v2841_v7 }
 0x156   :  { %2695 = vmatprep.subr.bf16.mxu0 %v2830_v21  ;;  %2704 = vmatpush3.bf16.msra.mxu1 %v2832_v17 }
 0x157   :  { %2705 = vmatprep.subr.bf16.mxu1 %v2841_v7 }
 0x159   :  { %2696 = vmatpush3.bf16.msra.mxu0 %v2830_v21 }
 0x15a   :  { %2697 = vmatprep.subr.bf16.mxu0 %v2831_v52  ;;  %2706 = vmatpush3.bf16.msra.mxu1 %v2833_v49 }
 0x15b   :  { %2054 = vmatmul.mubr.bf16.gmra.mrb[44].mxu1 %v1250_v37  ;;  %2707 = vmatprep.subr.bf16.mxu1 %v2841_v7 }
 0x15c   :  { %2719 = vmatprep.mubr.msk.bf16.mxu1 %vm2842_vm10, %v2841_v7 }
 0x15d   :  { %2698 = vmatpush3.bf16.msra.mxu0 %v2831_v52 }
 0x15e   :  { %2708 = vmatpush3.bf16.msra.mxu1 %v2834_v54 }
 0x15f   :  { %2709 = vmatprep.subr.bf16.mxu1 %v2841_v7 }
 0x160   :  { %2700 = vmatmul.mubr.bf16.vlgmr.msra.gmra.mrb[48].mxu0 %v1282_v57 }
 0x162   :  { %2710 = vmatpush3.bf16.msra.mxu1 %v2835_v61 }
 0x163   :  { %2711 = vmatprep.subr.bf16.mxu1 %v2841_v7 }
 0x166   :  { %2712 = vmatpush3.bf16.msra.mxu1 %v2836_v32 }
 0x167   :  { %2713 = vmatprep.subr.bf16.mxu1 %v2841_v7 }
 0x16a   :  { %2714 = vmatpush3.bf16.msra.mxu1 %v2837_v53 }
 0x16b   :  { %2715 = vmatprep.subr.bf16.mxu1 %v2841_v7 }
 0x16e   :  { %2716 = vmatpush3.bf16.msra.mxu1 %v2838_v5 }
 0x16f   :  { %2717 = vmatprep.subr.bf16.mxu1 %v2841_v7 }
 0x172   :  { %2718 = vmatpush3.bf16.msra.mxu1 %v2839_v55 }
 0x1f1   :  { %v2488_v24 = vpop.f32.mrb[32].mxu0 }
 0x1f2   :  { %v2489_v34 = vpop.f32.mrb[33].mxu0 }
 0x1f3   :  { %v2490_v14 = vadd.f32 %v2489_v34, %v2488_v24  ;;  %v2491_v8 = vpop.f32.mrb[34].mxu0 }
 0x1f4   :  { %v2492_v56 = vpop.f32.mrb[35].mxu0 }
 0x1f5   :  { %v2493_v1 = vadd.f32 %v2492_v56, %v2491_v8  ;;  %v1901_v6 = vadd.f32 %v2490_v14, %v2350_v9 }
 0x1f7   :  { %v1904_v46 = vadd.f32 %v2493_v1, %v2350_v9 }
 0x1f8   :  { %v2516_v45 = vpop.f32.mrb[32].mxu1 }
 0x1f9   :  { %v2517_v38 = vpop.f32.mrb[33].mxu1 }
 0x1fa   :  { %v2518_v43 = vadd.f32 %v2517_v38, %v2516_v45  ;;  %v2519_v62 = vpop.f32.mrb[34].mxu1 }
 0x1fb   :  { %v2520_v13 = vpop.f32.mrb[35].mxu1 }
 0x1fc   :  { %v2494_v47 = vpop.f32.mrb[36].mxu0  ;;  %v1950_v25 = vadd.f32 %v2518_v43, %v1901_v6  ;;  %v2521_v2 = vadd.f32 %v2520_v13, %v2519_v62 }
 0x1fd   :  { %v2495_v63 = vpop.f32.mrb[37].mxu0 }
 0x1fe   :  { %v2496_v26 = vadd.f32 %v2495_v63, %v2494_v47  ;;  %v2497_v35 = vpop.f32.mrb[38].mxu0  ;;  %v1953_v3 = vadd.f32 %v2521_v2, %v1904_v46  ;;  %v2423_v63 = vld [vmem:[%s3878_s6] ss:$0 sm:$0xff] }
 0x1ff   :  { %v2498_v60 = vpop.f32.mrb[39].mxu0 }
 0x200   :  { %v2499_v40 = vadd.f32 %v2498_v60, %v2497_v35  ;;  %v1909_v28 = vadd.f32 %v2496_v26, %v2350_v9 }
 0x202   :  { %v1912_v15 = vadd.f32 %v2499_v40, %v2350_v9 }
 0x212   :  { %v2544_v16 = vpop.f32.mrb[40].mxu0 }
 0x213   :  { %v2545_v29 = vpop.f32.mrb[41].mxu0 }
 0x214   :  { %v2546_v27 = vadd.f32 %v2545_v29, %v2544_v16  ;;  %v2547_v12 = vpop.f32.mrb[42].mxu0 }
 0x215   :  { %v2548_v44 = vpop.f32.mrb[43].mxu0 }
 0x216   :  { %v1999_v20 = vadd.f32 %v2546_v27, %v1950_v25  ;;  %v2549_v23 = vadd.f32 %v2548_v44, %v2547_v12 }
 0x218   :  { %v2002_v33 = vadd.f32 %v2549_v23, %v1953_v3 }
 0x21e   :  { %v2522_v19 = vpop.f32.mrb[36].mxu1 }
 0x21f   :  { %v2523_v48 = vpop.f32.mrb[37].mxu1 }
 0x220   :  { %v2524_v22 = vadd.f32 %v2523_v48, %v2522_v19  ;;  %v2525_v31 = vpop.f32.mrb[38].mxu1 }
 0x221   :  { %v2526_v30 = vpop.f32.mrb[39].mxu1 }
 0x222   :  { %v1958_v50 = vadd.f32 %v2524_v22, %v1909_v28  ;;  %v2527_v36 = vadd.f32 %v2526_v30, %v2525_v31 }
 0x224   :  { %v1961_v18 = vadd.f32 %v2527_v36, %v1912_v15 }
 0x226   :  { %v2550_v39 = vpop.f32.mrb[44].mxu0  ;;  %v2572_v59 = vpop.f32.mrb[40].mxu1 }
 0x227   :  { %v2551_v41 = vpop.f32.mrb[45].mxu0  ;;  %v2573_v11 = vpop.f32.mrb[41].mxu1 }
 0x228   :  { %v2552_v0 = vadd.f32 %v2551_v41, %v2550_v39  ;;  %v2553_v4 = vpop.f32.mrb[46].mxu0  ;;  %v2574_v57 = vadd.f32 %v2573_v11, %v2572_v59  ;;  %v2575_v10 = vpop.f32.mrb[42].mxu1 }
 0x229   :  { %v2554_v51 = vpop.f32.mrb[47].mxu0  ;;  %v2576_v37 = vpop.f32.mrb[43].mxu1 }
 0x22a   :  { %v2007_v58 = vadd.f32 %v2552_v0, %v1958_v50  ;;  %v2555_v42 = vadd.f32 %v2554_v51, %v2553_v4  ;;  %v2577_v52 = vadd.f32 %v2576_v37, %v2575_v10  ;;  %v2048_v7 = vadd.f32 %v2574_v57, %v1999_v20 }
 0x22c   :  { %v2010_v21 = vadd.f32 %v2555_v42, %v1961_v18  ;;  %v2051_v17 = vadd.f32 %v2577_v52, %v2002_v33 }
 0x22e   :  { %v2578_v49 = vpop.f32.mrb[44].mxu1 }
 0x22f   :  { %v2579_v54 = vpop.f32.mrb[45].mxu1 }
 0x230   :  { %v2580_v61 = vadd.f32 %v2579_v54, %v2578_v49  ;;  %v2581_v32 = vpop.f32.mrb[46].mxu1 }
 0x231   :  { %v2582_v53 = vpop.f32.mrb[47].mxu1 }
 0x232   :  { %v2583_v5 = vadd.f32 %v2582_v53, %v2581_v32  ;;  %v2056_v55 = vadd.f32 %v2580_v61, %v2007_v58 }
 0x233   :  { %v2701_v24 = vpop.f32.mrb[48].mxu0 }
 0x234   :  { %v2059_v34 = vadd.f32 %v2583_v5, %v2010_v21  ;;  %v2105_v9 = vadd.f32 %v2701_v24, %v2056_v55  ;;  %v2096_v14 = vpop.f32.mrb[49].mxu0 }
 0x235   :  { %v2097_v8 = vadd.f32 %v2096_v14, %v2048_v7  ;;  %v2702_v56 = vpop.f32.mrb[50].mxu0 }
 0x236   :  { %v2108_v1 = vadd.f32 %v2702_v56, %v2059_v34  ;;  %v2099_v45 = vpop.f32.mrb[51].mxu0  ;;  %v2113_v62 = vmax.f32 %v2105_v9, 0.0 }
 0x237   :  { %v2100_v6 = vadd.f32 %v2099_v45, %v2051_v17  ;;  %v2111_v38 = vmax.f32 %v2097_v8, 0.0 }
 0x238   :  { %v2114_v13 = vmax.f32 %v2108_v1, 0.0 }
 0x239   :  { %v2112_v43 = vmax.f32 %v2100_v6, 0.0 }
 0x23b   :  { %v2115_v46 = vmax.f32 %v2111_v38, %v2112_v43 }
 0x23d   :  { %v2116_v47 = vmax.f32 %v2115_v46, %v2113_v62 }
 0x23f   :  { %v2117_v25 = vmax.f32 %v2116_v47, %v2114_v13 }
 0x241   :  { %v2118_v2 = vpack.c.bf16 %v2117_v25, %v2117_v25 }
 0x243   :  { %2720 = vmatmul.mubr.bf16.vlgmr.msra.gmra.mrb[48].mxu1 %v2118_v2 }
 0x316   :  { %v2224_v26 = vpop.f32.mrb[48].mxu1 }
 0x317   :  { %v2225_v35 = vadd.f32 %v2423_v63, %v2224_v26  ;;  %v2721_v3 = vpop.f32.mrb[49].mxu1 }
 0x318   :  { %v2227_v60 = vpop.f32.mrb[50].mxu1 }
 0x319   :  { %2230 = vst [vmem:[%s3879_s7] sm:$0xff] %v2225_v35  ;;  %v2722_v40 = vpop.f32.mrb[51].mxu1 }

</bundles_post_ra>
